<compile_context>
chip_gen: v6e
topology: v6e:2x2x1
jax: 0.10.0
libtpu: 0.0.40
codegen_flags: <defaults>
</compile_context>

<pallas_src>
import jax
import jax.numpy as jnp
from jax.experimental import pallas as pl
from jax.experimental.pallas import tpu as pltpu

C = 16  # working channel width (conv1's 3 input channels are zero-padded to 16)


def _prep_weights(params):
    """Fold 1x1 convs into the neighboring 3x3 convs (exact: no nonlinearity in
    between and a 1x1/pad-0 conv is pure channel mixing), then lay the three
    remaining 3x3 kernels out as 27 per-tap (Cout, Cin) matrices."""
    w1, w2, w3, w4, w5 = params                        # HWIO
    wA = jnp.einsum('hwim,mo->hwio', w1, w2[0, 0])     # (3,3,3,16)  conv1 ∘ conv2
    wB = jnp.einsum('hwim,mo->hwio', w3, w4[0, 0])     # (3,3,16,16) conv3 ∘ conv4
    wC = w5                                            # (3,3,16,16) conv5
    wA = jnp.pad(wA, ((0, 0), (0, 0), (0, C - wA.shape[2]), (0, 0)))

    def tapify(w):  # (3,3,Cin,Cout) -> (9, Cout, Cin), tap index t = kh*3 + kw
        return jnp.transpose(w, (0, 1, 3, 2)).reshape(9, C, C)

    return jnp.concatenate([tapify(wA), tapify(wB), tapify(wC)], axis=0)  # (27,16,16)


def _make_kernel(H, W, lpad):
    HW = H * W

    def kernel(x_ref, w_ref, m_ref, o_ref, pad_ref):
        # x_ref  : (1, 16, HW)    channel-padded, NCHW-flattened input (VMEM)
        # w_ref  : (27, 16, 16)   per-layer, per-tap (Cout, Cin) weights
        # m_ref  : (2, 16, HW)    edge masks: [0] kills w=W-1 (dw=+1), [1] kills w=0
        # o_ref  : (1, 16, HW)    NCHW-flattened output (lane-dense)
        # pad_ref: (16, lpad+HW+lpad) flat zero-margined activation scratch
        zeros_m = jnp.zeros((C, lpad), jnp.float32)
        pad_ref[:, pl.ds(0, lpad)] = zeros_m            # aligned; megacore-safe
        pad_ref[:, pl.ds(lpad + HW, lpad)] = zeros_m

        m_right = m_ref[0]                              # (16, HW)
        m_left = m_ref[1]

        act = x_ref[0].astype(jnp.float32)              # (16, HW)
        for layer in range(3):
            # Aligned interior write; margins stay zero and absorb dh padding.
            pad_ref[:, pl.ds(lpad, HW)] = act
            acc = None
            t = 0
            for dh in (-1, 0, 1):
                for dw in (-1, 0, 1):
                    shift = dh * W + dw
                    tap = pad_ref[:, pl.ds(lpad + shift, HW)]   # (16, HW)
                    if dw == 1:
                        tap = tap * m_right             # mask horizontal wrap
                    elif dw == -1:
                        tap = tap * m_left
                    d = jnp.dot(w_ref[layer * 9 + t], tap,
                                preferred_element_type=jnp.float32)
                    acc = d if acc is None else acc + d
                    t += 1
            act = acc
        # SiLU, then a lane-dense (multiple-of-128-wide) unmasked store already
        # in NCHW-flattened order — no transpose needed.
        o_ref[0] = (act * jax.nn.sigmoid(act)).astype(o_ref.dtype)

    return kernel


@jax.jit
def model_forward(x_nchw, params):
    N, Cin, H, W = x_nchw.shape
    HW = H * W
    lpad = ((W + 1 + 127) // 128) * 128   # lane-aligned margin, >= W+1

    # NCHW -> (N, C, H*W): free reshape; pad channels 3 -> 16 once (tiny).
    x = x_nchw.reshape(N, Cin, HW)
    x = jnp.pad(x, ((0, 0), (0, C - Cin), (0, 0))).astype(jnp.float32)

    w_all = _prep_weights(params)                       # (27, 16, 16)

    col = jnp.arange(HW, dtype=jnp.int32) % W
    m_right = (col != (W - 1)).astype(jnp.float32)      # for taps with dw = +1
    m_left = (col != 0).astype(jnp.float32)             # for taps with dw = -1
    masks = jnp.broadcast_to(jnp.stack([m_right, m_left])[:, None, :],
                             (2, C, HW)).astype(jnp.float32)

    out_flat = pl.pallas_call(
        _make_kernel(H, W, lpad),
        out_shape=jax.ShapeDtypeStruct((N, C, HW), x_nchw.dtype),
        grid=(N,),
        in_specs=[
            pl.BlockSpec((1, C, HW), lambda n: (n, 0, 0)),
            pl.BlockSpec((27, C, C), lambda n: (0, 0, 0)),
            pl.BlockSpec((2, C, HW), lambda n: (0, 0, 0)),
        ],
        out_specs=pl.BlockSpec((1, C, HW), lambda n: (n, 0, 0)),
        scratch_shapes=[pltpu.VMEM((C, lpad + HW + lpad), jnp.float32)],
        compiler_params=pltpu.CompilerParams(
            dimension_semantics=("parallel",)),
    )(x, w_all, masks)

    # Metadata-only reshape back to NCHW.
    return out_flat.reshape(N, C, H, W)


def init_params(key):
    """Deterministic Conv2d weights (HWIO), PyTorch-style uniform fan-in init."""
    shapes = [
        (3, 3, 3, 16),    # conv_1
        (1, 1, 16, 16),   # conv_2
        (3, 3, 16, 16),   # conv_3
        (1, 1, 16, 16),   # conv_4
        (3, 3, 16, 16),   # conv_5
    ]
    params = []
    for s in shapes:
        key, sub = jax.random.split(key)
        fan_in = s[0] * s[1] * s[2]
        bound = 1.0 / (fan_in ** 0.5)
        params.append(
            jax.random.uniform(sub, s, jnp.float32, minval=-bound, maxval=bound))
    return params


def _conv_ref(x, w, padding):
    return jax.lax.conv_general_dilated(
        x, w, window_strides=(1, 1),
        padding=((padding, padding), (padding, padding)),
        dimension_numbers=("NHWC", "HWIO", "NHWC"))


def _model_ref(x_nchw, params):
    x = jnp.transpose(x_nchw, (0, 2, 3, 1))
    w1, w2, w3, w4, w5 = params
    v1 = _conv_ref(x, w1, 1)
    v2 = _conv_ref(v1, w2, 0)
    v3 = _conv_ref(v2, w3, 1)
    v4 = _conv_ref(v3, w4, 0)
    v5 = _conv_ref(v4, w5, 1)
    v7 = v5 * jax.nn.sigmoid(v5)
    return jnp.transpose(v7, (0, 3, 1, 2))


if __name__ == "__main__":
    key = jax.random.PRNGKey(0)
    k_x, k_p = jax.random.split(key)

    # Small shapes consistent with the module (Cin must be 3).
    N, Cin, H, W = 2, 3, 16, 16
    x = jax.random.normal(k_x, (N, Cin, H, W), jnp.float32)
    params = init_params(k_p)

    out = jax.block_until_ready(model_forward(x, params))
    ref = _model_ref(x, params)

    assert out.shape == (N, 16, H, W), out.shape
    assert jnp.allclose(out, ref, atol=1e-3, rtol=1e-3), \
        float(jnp.max(jnp.abs(out - ref)))

    print("KERNEL_OK")
</pallas_src>

<mosaic_0001>
module attributes {stable_mosaic.version = 11 : i64} {
  func.func @kernel(%arg0: i32, %arg1: memref<1x16x256xf32, #tpu.memory_space<vmem>>, %arg2: memref<27x16x16xf32, #tpu.memory_space<vmem>>, %arg3: memref<2x16x256xf32, #tpu.memory_space<vmem>>, %arg4: memref<1x16x256xf32, #tpu.memory_space<vmem>>, %arg5: memref<16x512xf32, #tpu.memory_space<vmem>>) attributes {dimension_semantics = [#tpu.dimension_semantics<parallel>], iteration_bounds = array<i64: 2>, scalar_prefetch = 0 : i64, scratch_operands = 1 : i64, tpu.core_type = #tpu.core_type<tc>, window_params = [{transform_indices = @transform_0, window_bounds = array<i64: 1, 16, 256>}, {pipeline_mode = #tpu.pipeline_mode<synchronous>, transform_indices = @transform_1, window_bounds = array<i64: 27, 16, 16>}, {pipeline_mode = #tpu.pipeline_mode<synchronous>, transform_indices = @transform_2, window_bounds = array<i64: 2, 16, 256>}, {transform_indices = @transform_3, window_bounds = array<i64: 1, 16, 256>}]} {
    %cst = arith.constant 0.000000e+00 : f32
    %0 = vector.broadcast %cst : f32 to vector<16x128xf32>
    %c0 = arith.constant 0 : index
    %c0_0 = arith.constant 0 : index
    %1 = vector.load %arg5[%c0, %c0_0] : memref<16x512xf32, #tpu.memory_space<vmem>>, vector<16x128xf32>
    tpu.vector_store %arg5[%c0, %c0_0], %0 {strides = array<i32>} : memref<16x512xf32, #tpu.memory_space<vmem>>, vector<16x128xf32>,
    %c0_1 = arith.constant 0 : index
    %c384 = arith.constant 384 : index
    %2 = vector.load %arg5[%c0_1, %c384] : memref<16x512xf32, #tpu.memory_space<vmem>>, vector<16x128xf32>
    tpu.vector_store %arg5[%c0_1, %c384], %0 {strides = array<i32>} : memref<16x512xf32, #tpu.memory_space<vmem>>, vector<16x128xf32>,
    %c0_2 = arith.constant 0 : index
    %c0_3 = arith.constant 0 : index
    %c0_4 = arith.constant 0 : index
    %3 = vector.load %arg3[%c0_2, %c0_3, %c0_4] : memref<2x16x256xf32, #tpu.memory_space<vmem>>, vector<1x16x256xf32>
    %4 = vector.shape_cast %3 : vector<1x16x256xf32> to vector<16x256xf32>
    %c1 = arith.constant 1 : index
    %c0_5 = arith.constant 0 : index
    %c0_6 = arith.constant 0 : index
    %5 = vector.load %arg3[%c1, %c0_5, %c0_6] : memref<2x16x256xf32, #tpu.memory_space<vmem>>, vector<1x16x256xf32>
    %6 = vector.shape_cast %5 : vector<1x16x256xf32> to vector<16x256xf32>
    %c0_7 = arith.constant 0 : index
    %c0_8 = arith.constant 0 : index
    %c0_9 = arith.constant 0 : index
    %7 = vector.load %arg1[%c0_7, %c0_8, %c0_9] : memref<1x16x256xf32, #tpu.memory_space<vmem>>, vector<1x16x256xf32>
    %8 = vector.shape_cast %7 : vector<1x16x256xf32> to vector<16x256xf32>
    %c0_10 = arith.constant 0 : index
    %c128 = arith.constant 128 : index
    %9 = vector.load %arg5[%c0_10, %c128] : memref<16x512xf32, #tpu.memory_space<vmem>>, vector<16x256xf32>
    tpu.vector_store %arg5[%c0_10, %c128], %8 {strides = array<i32>} : memref<16x512xf32, #tpu.memory_space<vmem>>, vector<16x256xf32>,
    %c0_11 = arith.constant 0 : index
    %c111 = arith.constant 111 : index
    %10 = vector.load %arg5[%c0_11, %c111] : memref<16x512xf32, #tpu.memory_space<vmem>>, vector<16x256xf32>
    %11 = arith.mulf %10, %6 : vector<16x256xf32>
    %c0_12 = arith.constant 0 : index
    %c0_13 = arith.constant 0 : index
    %c0_14 = arith.constant 0 : index
    %12 = vector.load %arg2[%c0_12, %c0_13, %c0_14] : memref<27x16x16xf32, #tpu.memory_space<vmem>>, vector<1x16x16xf32>
    %13 = vector.shape_cast %12 : vector<1x16x16xf32> to vector<16x16xf32>
    %cst_15 = arith.constant dense<0.000000e+00> : vector<16x256xf32>
    %14 = tpu.matmul %13, %11, %cst_15 {dimension_numbers = #tpu.dot_dimension_numbers<[1], [0], [0], [1], [0, 0, 1, 1], [], []>} : vector<16x16xf32>, vector<16x256xf32>, vector<16x256xf32> -> vector<16x256xf32>
    %c0_16 = arith.constant 0 : index
    %c112 = arith.constant 112 : index
    %15 = vector.load %arg5[%c0_16, %c112] : memref<16x512xf32, #tpu.memory_space<vmem>>, vector<16x256xf32>
    %c1_17 = arith.constant 1 : index
    %c0_18 = arith.constant 0 : index
    %c0_19 = arith.constant 0 : index
    %16 = vector.load %arg2[%c1_17, %c0_18, %c0_19] : memref<27x16x16xf32, #tpu.memory_space<vmem>>, vector<1x16x16xf32>
    %17 = vector.shape_cast %16 : vector<1x16x16xf32> to vector<16x16xf32>
    %cst_20 = arith.constant dense<0.000000e+00> : vector<16x256xf32>
    %18 = tpu.matmul %17, %15, %cst_20 {dimension_numbers = #tpu.dot_dimension_numbers<[1], [0], [0], [1], [0, 0, 1, 1], [], []>} : vector<16x16xf32>, vector<16x256xf32>, vector<16x256xf32> -> vector<16x256xf32>
    %19 = arith.addf %14, %18 : vector<16x256xf32>
    %c0_21 = arith.constant 0 : index
    %c113 = arith.constant 113 : index
    %20 = vector.load %arg5[%c0_21, %c113] : memref<16x512xf32, #tpu.memory_space<vmem>>, vector<16x256xf32>
    %21 = arith.mulf %20, %4 : vector<16x256xf32>
    %c2 = arith.constant 2 : index
    %c0_22 = arith.constant 0 : index
    %c0_23 = arith.constant 0 : index
    %22 = vector.load %arg2[%c2, %c0_22, %c0_23] : memref<27x16x16xf32, #tpu.memory_space<vmem>>, vector<1x16x16xf32>
    %23 = vector.shape_cast %22 : vector<1x16x16xf32> to vector<16x16xf32>
    %cst_24 = arith.constant dense<0.000000e+00> : vector<16x256xf32>
    %24 = tpu.matmul %23, %21, %cst_24 {dimension_numbers = #tpu.dot_dimension_numbers<[1], [0], [0], [1], [0, 0, 1, 1], [], []>} : vector<16x16xf32>, vector<16x256xf32>, vector<16x256xf32> -> vector<16x256xf32>
    %25 = arith.addf %19, %24 : vector<16x256xf32>
    %c0_25 = arith.constant 0 : index
    %c127 = arith.constant 127 : index
    %26 = vector.load %arg5[%c0_25, %c127] : memref<16x512xf32, #tpu.memory_space<vmem>>, vector<16x256xf32>
    %27 = arith.mulf %26, %6 : vector<16x256xf32>
    %c3 = arith.constant 3 : index
    %c0_26 = arith.constant 0 : index
    %c0_27 = arith.constant 0 : index
    %28 = vector.load %arg2[%c3, %c0_26, %c0_27] : memref<27x16x16xf32, #tpu.memory_space<vmem>>, vector<1x16x16xf32>
    %29 = vector.shape_cast %28 : vector<1x16x16xf32> to vector<16x16xf32>
    %cst_28 = arith.constant dense<0.000000e+00> : vector<16x256xf32>
    %30 = tpu.matmul %29, %27, %cst_28 {dimension_numbers = #tpu.dot_dimension_numbers<[1], [0], [0], [1], [0, 0, 1, 1], [], []>} : vector<16x16xf32>, vector<16x256xf32>, vector<16x256xf32> -> vector<16x256xf32>
    %31 = arith.addf %25, %30 : vector<16x256xf32>
    %c0_29 = arith.constant 0 : index
    %c128_30 = arith.constant 128 : index
    %32 = vector.load %arg5[%c0_29, %c128_30] : memref<16x512xf32, #tpu.memory_space<vmem>>, vector<16x256xf32>
    %c4 = arith.constant 4 : index
    %c0_31 = arith.constant 0 : index
    %c0_32 = arith.constant 0 : index
    %33 = vector.load %arg2[%c4, %c0_31, %c0_32] : memref<27x16x16xf32, #tpu.memory_space<vmem>>, vector<1x16x16xf32>
    %34 = vector.shape_cast %33 : vector<1x16x16xf32> to vector<16x16xf32>
    %cst_33 = arith.constant dense<0.000000e+00> : vector<16x256xf32>
    %35 = tpu.matmul %34, %32, %cst_33 {dimension_numbers = #tpu.dot_dimension_numbers<[1], [0], [0], [1], [0, 0, 1, 1], [], []>} : vector<16x16xf32>, vector<16x256xf32>, vector<16x256xf32> -> vector<16x256xf32>
    %36 = arith.addf %31, %35 : vector<16x256xf32>
    %c0_34 = arith.constant 0 : index
    %c129 = arith.constant 129 : index
    %37 = vector.load %arg5[%c0_34, %c129] : memref<16x512xf32, #tpu.memory_space<vmem>>, vector<16x256xf32>
    %38 = arith.mulf %37, %4 : vector<16x256xf32>
    %c5 = arith.constant 5 : index
    %c0_35 = arith.constant 0 : index
    %c0_36 = arith.constant 0 : index
    %39 = vector.load %arg2[%c5, %c0_35, %c0_36] : memref<27x16x16xf32, #tpu.memory_space<vmem>>, vector<1x16x16xf32>
    %40 = vector.shape_cast %39 : vector<1x16x16xf32> to vector<16x16xf32>
    %cst_37 = arith.constant dense<0.000000e+00> : vector<16x256xf32>
    %41 = tpu.matmul %40, %38, %cst_37 {dimension_numbers = #tpu.dot_dimension_numbers<[1], [0], [0], [1], [0, 0, 1, 1], [], []>} : vector<16x16xf32>, vector<16x256xf32>, vector<16x256xf32> -> vector<16x256xf32>
    %42 = arith.addf %36, %41 : vector<16x256xf32>
    %c0_38 = arith.constant 0 : index
    %c143 = arith.constant 143 : index
    %43 = vector.load %arg5[%c0_38, %c143] : memref<16x512xf32, #tpu.memory_space<vmem>>, vector<16x256xf32>
    %44 = arith.mulf %43, %6 : vector<16x256xf32>
    %c6 = arith.constant 6 : index
    %c0_39 = arith.constant 0 : index
    %c0_40 = arith.constant 0 : index
    %45 = vector.load %arg2[%c6, %c0_39, %c0_40] : memref<27x16x16xf32, #tpu.memory_space<vmem>>, vector<1x16x16xf32>
    %46 = vector.shape_cast %45 : vector<1x16x16xf32> to vector<16x16xf32>
    %cst_41 = arith.constant dense<0.000000e+00> : vector<16x256xf32>
    %47 = tpu.matmul %46, %44, %cst_41 {dimension_numbers = #tpu.dot_dimension_numbers<[1], [0], [0], [1], [0, 0, 1, 1], [], []>} : vector<16x16xf32>, vector<16x256xf32>, vector<16x256xf32> -> vector<16x256xf32>
    %48 = arith.addf %42, %47 : vector<16x256xf32>
    %c0_42 = arith.constant 0 : index
    %c144 = arith.constant 144 : index
    %49 = vector.load %arg5[%c0_42, %c144] : memref<16x512xf32, #tpu.memory_space<vmem>>, vector<16x256xf32>
    %c7 = arith.constant 7 : index
    %c0_43 = arith.constant 0 : index
    %c0_44 = arith.constant 0 : index
    %50 = vector.load %arg2[%c7, %c0_43, %c0_44] : memref<27x16x16xf32, #tpu.memory_space<vmem>>, vector<1x16x16xf32>
    %51 = vector.shape_cast %50 : vector<1x16x16xf32> to vector<16x16xf32>
    %cst_45 = arith.constant dense<0.000000e+00> : vector<16x256xf32>
    %52 = tpu.matmul %51, %49, %cst_45 {dimension_numbers = #tpu.dot_dimension_numbers<[1], [0], [0], [1], [0, 0, 1, 1], [], []>} : vector<16x16xf32>, vector<16x256xf32>, vector<16x256xf32> -> vector<16x256xf32>
    %53 = arith.addf %48, %52 : vector<16x256xf32>
    %c0_46 = arith.constant 0 : index
    %c145 = arith.constant 145 : index
    %54 = vector.load %arg5[%c0_46, %c145] : memref<16x512xf32, #tpu.memory_space<vmem>>, vector<16x256xf32>
    %55 = arith.mulf %54, %4 : vector<16x256xf32>
    %c8 = arith.constant 8 : index
    %c0_47 = arith.constant 0 : index
    %c0_48 = arith.constant 0 : index
    %56 = vector.load %arg2[%c8, %c0_47, %c0_48] : memref<27x16x16xf32, #tpu.memory_space<vmem>>, vector<1x16x16xf32>
    %57 = vector.shape_cast %56 : vector<1x16x16xf32> to vector<16x16xf32>
    %cst_49 = arith.constant dense<0.000000e+00> : vector<16x256xf32>
    %58 = tpu.matmul %57, %55, %cst_49 {dimension_numbers = #tpu.dot_dimension_numbers<[1], [0], [0], [1], [0, 0, 1, 1], [], []>} : vector<16x16xf32>, vector<16x256xf32>, vector<16x256xf32> -> vector<16x256xf32>
    %59 = arith.addf %53, %58 : vector<16x256xf32>
    %c0_50 = arith.constant 0 : index
    %c128_51 = arith.constant 128 : index
    %60 = vector.load %arg5[%c0_50, %c128_51] : memref<16x512xf32, #tpu.memory_space<vmem>>, vector<16x256xf32>
    tpu.vector_store %arg5[%c0_50, %c128_51], %59 {strides = array<i32>} : memref<16x512xf32, #tpu.memory_space<vmem>>, vector<16x256xf32>,
    %c0_52 = arith.constant 0 : index
    %c111_53 = arith.constant 111 : index
    %61 = vector.load %arg5[%c0_52, %c111_53] : memref<16x512xf32, #tpu.memory_space<vmem>>, vector<16x256xf32>
    %62 = arith.mulf %61, %6 : vector<16x256xf32>
    %c9 = arith.constant 9 : index
    %c0_54 = arith.constant 0 : index
    %c0_55 = arith.constant 0 : index
    %63 = vector.load %arg2[%c9, %c0_54, %c0_55] : memref<27x16x16xf32, #tpu.memory_space<vmem>>, vector<1x16x16xf32>
    %64 = vector.shape_cast %63 : vector<1x16x16xf32> to vector<16x16xf32>
    %cst_56 = arith.constant dense<0.000000e+00> : vector<16x256xf32>
    %65 = tpu.matmul %64, %62, %cst_56 {dimension_numbers = #tpu.dot_dimension_numbers<[1], [0], [0], [1], [0, 0, 1, 1], [], []>} : vector<16x16xf32>, vector<16x256xf32>, vector<16x256xf32> -> vector<16x256xf32>
    %c0_57 = arith.constant 0 : index
    %c112_58 = arith.constant 112 : index
    %66 = vector.load %arg5[%c0_57, %c112_58] : memref<16x512xf32, #tpu.memory_space<vmem>>, vector<16x256xf32>
    %c10 = arith.constant 10 : index
    %c0_59 = arith.constant 0 : index
    %c0_60 = arith.constant 0 : index
    %67 = vector.load %arg2[%c10, %c0_59, %c0_60] : memref<27x16x16xf32, #tpu.memory_space<vmem>>, vector<1x16x16xf32>
    %68 = vector.shape_cast %67 : vector<1x16x16xf32> to vector<16x16xf32>
    %cst_61 = arith.constant dense<0.000000e+00> : vector<16x256xf32>
    %69 = tpu.matmul %68, %66, %cst_61 {dimension_numbers = #tpu.dot_dimension_numbers<[1], [0], [0], [1], [0, 0, 1, 1], [], []>} : vector<16x16xf32>, vector<16x256xf32>, vector<16x256xf32> -> vector<16x256xf32>
    %70 = arith.addf %65, %69 : vector<16x256xf32>
    %c0_62 = arith.constant 0 : index
    %c113_63 = arith.constant 113 : index
    %71 = vector.load %arg5[%c0_62, %c113_63] : memref<16x512xf32, #tpu.memory_space<vmem>>, vector<16x256xf32>
    %72 = arith.mulf %71, %4 : vector<16x256xf32>
    %c11 = arith.constant 11 : index
    %c0_64 = arith.constant 0 : index
    %c0_65 = arith.constant 0 : index
    %73 = vector.load %arg2[%c11, %c0_64, %c0_65] : memref<27x16x16xf32, #tpu.memory_space<vmem>>, vector<1x16x16xf32>
    %74 = vector.shape_cast %73 : vector<1x16x16xf32> to vector<16x16xf32>
    %cst_66 = arith.constant dense<0.000000e+00> : vector<16x256xf32>
    %75 = tpu.matmul %74, %72, %cst_66 {dimension_numbers = #tpu.dot_dimension_numbers<[1], [0], [0], [1], [0, 0, 1, 1], [], []>} : vector<16x16xf32>, vector<16x256xf32>, vector<16x256xf32> -> vector<16x256xf32>
    %76 = arith.addf %70, %75 : vector<16x256xf32>
    %c0_67 = arith.constant 0 : index
    %c127_68 = arith.constant 127 : index
    %77 = vector.load %arg5[%c0_67, %c127_68] : memref<16x512xf32, #tpu.memory_space<vmem>>, vector<16x256xf32>
    %78 = arith.mulf %77, %6 : vector<16x256xf32>
    %c12 = arith.constant 12 : index
    %c0_69 = arith.constant 0 : index
    %c0_70 = arith.constant 0 : index
    %79 = vector.load %arg2[%c12, %c0_69, %c0_70] : memref<27x16x16xf32, #tpu.memory_space<vmem>>, vector<1x16x16xf32>
    %80 = vector.shape_cast %79 : vector<1x16x16xf32> to vector<16x16xf32>
    %cst_71 = arith.constant dense<0.000000e+00> : vector<16x256xf32>
    %81 = tpu.matmul %80, %78, %cst_71 {dimension_numbers = #tpu.dot_dimension_numbers<[1], [0], [0], [1], [0, 0, 1, 1], [], []>} : vector<16x16xf32>, vector<16x256xf32>, vector<16x256xf32> -> vector<16x256xf32>
    %82 = arith.addf %76, %81 : vector<16x256xf32>
    %c0_72 = arith.constant 0 : index
    %c128_73 = arith.constant 128 : index
    %83 = vector.load %arg5[%c0_72, %c128_73] : memref<16x512xf32, #tpu.memory_space<vmem>>, vector<16x256xf32>
    %c13 = arith.constant 13 : index
    %c0_74 = arith.constant 0 : index
    %c0_75 = arith.constant 0 : index
    %84 = vector.load %arg2[%c13, %c0_74, %c0_75] : memref<27x16x16xf32, #tpu.memory_space<vmem>>, vector<1x16x16xf32>
    %85 = vector.shape_cast %84 : vector<1x16x16xf32> to vector<16x16xf32>
    %cst_76 = arith.constant dense<0.000000e+00> : vector<16x256xf32>
    %86 = tpu.matmul %85, %83, %cst_76 {dimension_numbers = #tpu.dot_dimension_numbers<[1], [0], [0], [1], [0, 0, 1, 1], [], []>} : vector<16x16xf32>, vector<16x256xf32>, vector<16x256xf32> -> vector<16x256xf32>
    %87 = arith.addf %82, %86 : vector<16x256xf32>
    %c0_77 = arith.constant 0 : index
    %c129_78 = arith.constant 129 : index
    %88 = vector.load %arg5[%c0_77, %c129_78] : memref<16x512xf32, #tpu.memory_space<vmem>>, vector<16x256xf32>
    %89 = arith.mulf %88, %4 : vector<16x256xf32>
    %c14 = arith.constant 14 : index
    %c0_79 = arith.constant 0 : index
    %c0_80 = arith.constant 0 : index
    %90 = vector.load %arg2[%c14, %c0_79, %c0_80] : memref<27x16x16xf32, #tpu.memory_space<vmem>>, vector<1x16x16xf32>
    %91 = vector.shape_cast %90 : vector<1x16x16xf32> to vector<16x16xf32>
    %cst_81 = arith.constant dense<0.000000e+00> : vector<16x256xf32>
    %92 = tpu.matmul %91, %89, %cst_81 {dimension_numbers = #tpu.dot_dimension_numbers<[1], [0], [0], [1], [0, 0, 1, 1], [], []>} : vector<16x16xf32>, vector<16x256xf32>, vector<16x256xf32> -> vector<16x256xf32>
    %93 = arith.addf %87, %92 : vector<16x256xf32>
    %c0_82 = arith.constant 0 : index
    %c143_83 = arith.constant 143 : index
    %94 = vector.load %arg5[%c0_82, %c143_83] : memref<16x512xf32, #tpu.memory_space<vmem>>, vector<16x256xf32>
    %95 = arith.mulf %94, %6 : vector<16x256xf32>
    %c15 = arith.constant 15 : index
    %c0_84 = arith.constant 0 : index
    %c0_85 = arith.constant 0 : index
    %96 = vector.load %arg2[%c15, %c0_84, %c0_85] : memref<27x16x16xf32, #tpu.memory_space<vmem>>, vector<1x16x16xf32>
    %97 = vector.shape_cast %96 : vector<1x16x16xf32> to vector<16x16xf32>
    %cst_86 = arith.constant dense<0.000000e+00> : vector<16x256xf32>
    %98 = tpu.matmul %97, %95, %cst_86 {dimension_numbers = #tpu.dot_dimension_numbers<[1], [0], [0], [1], [0, 0, 1, 1], [], []>} : vector<16x16xf32>, vector<16x256xf32>, vector<16x256xf32> -> vector<16x256xf32>
    %99 = arith.addf %93, %98 : vector<16x256xf32>
    %c0_87 = arith.constant 0 : index
    %c144_88 = arith.constant 144 : index
    %100 = vector.load %arg5[%c0_87, %c144_88] : memref<16x512xf32, #tpu.memory_space<vmem>>, vector<16x256xf32>
    %c16 = arith.constant 16 : index
    %c0_89 = arith.constant 0 : index
    %c0_90 = arith.constant 0 : index
    %101 = vector.load %arg2[%c16, %c0_89, %c0_90] : memref<27x16x16xf32, #tpu.memory_space<vmem>>, vector<1x16x16xf32>
    %102 = vector.shape_cast %101 : vector<1x16x16xf32> to vector<16x16xf32>
    %cst_91 = arith.constant dense<0.000000e+00> : vector<16x256xf32>
    %103 = tpu.matmul %102, %100, %cst_91 {dimension_numbers = #tpu.dot_dimension_numbers<[1], [0], [0], [1], [0, 0, 1, 1], [], []>} : vector<16x16xf32>, vector<16x256xf32>, vector<16x256xf32> -> vector<16x256xf32>
    %104 = arith.addf %99, %103 : vector<16x256xf32>
    %c0_92 = arith.constant 0 : index
    %c145_93 = arith.constant 145 : index
    %105 = vector.load %arg5[%c0_92, %c145_93] : memref<16x512xf32, #tpu.memory_space<vmem>>, vector<16x256xf32>
    %106 = arith.mulf %105, %4 : vector<16x256xf32>
    %c17 = arith.constant 17 : index
    %c0_94 = arith.constant 0 : index
    %c0_95 = arith.constant 0 : index
    %107 = vector.load %arg2[%c17, %c0_94, %c0_95] : memref<27x16x16xf32, #tpu.memory_space<vmem>>, vector<1x16x16xf32>
    %108 = vector.shape_cast %107 : vector<1x16x16xf32> to vector<16x16xf32>
    %cst_96 = arith.constant dense<0.000000e+00> : vector<16x256xf32>
    %109 = tpu.matmul %108, %106, %cst_96 {dimension_numbers = #tpu.dot_dimension_numbers<[1], [0], [0], [1], [0, 0, 1, 1], [], []>} : vector<16x16xf32>, vector<16x256xf32>, vector<16x256xf32> -> vector<16x256xf32>
    %110 = arith.addf %104, %109 : vector<16x256xf32>
    %c0_97 = arith.constant 0 : index
    %c128_98 = arith.constant 128 : index
    %111 = vector.load %arg5[%c0_97, %c128_98] : memref<16x512xf32, #tpu.memory_space<vmem>>, vector<16x256xf32>
    tpu.vector_store %arg5[%c0_97, %c128_98], %110 {strides = array<i32>} : memref<16x512xf32, #tpu.memory_space<vmem>>, vector<16x256xf32>,
    %c0_99 = arith.constant 0 : index
    %c111_100 = arith.constant 111 : index
    %112 = vector.load %arg5[%c0_99, %c111_100] : memref<16x512xf32, #tpu.memory_space<vmem>>, vector<16x256xf32>
    %113 = arith.mulf %112, %6 : vector<16x256xf32>
    %c18 = arith.constant 18 : index
    %c0_101 = arith.constant 0 : index
    %c0_102 = arith.constant 0 : index
    %114 = vector.load %arg2[%c18, %c0_101, %c0_102] : memref<27x16x16xf32, #tpu.memory_space<vmem>>, vector<1x16x16xf32>
    %115 = vector.shape_cast %114 : vector<1x16x16xf32> to vector<16x16xf32>
    %cst_103 = arith.constant dense<0.000000e+00> : vector<16x256xf32>
    %116 = tpu.matmul %115, %113, %cst_103 {dimension_numbers = #tpu.dot_dimension_numbers<[1], [0], [0], [1], [0, 0, 1, 1], [], []>} : vector<16x16xf32>, vector<16x256xf32>, vector<16x256xf32> -> vector<16x256xf32>
    %c0_104 = arith.constant 0 : index
    %c112_105 = arith.constant 112 : index
    %117 = vector.load %arg5[%c0_104, %c112_105] : memref<16x512xf32, #tpu.memory_space<vmem>>, vector<16x256xf32>
    %c19 = arith.constant 19 : index
    %c0_106 = arith.constant 0 : index
    %c0_107 = arith.constant 0 : index
    %118 = vector.load %arg2[%c19, %c0_106, %c0_107] : memref<27x16x16xf32, #tpu.memory_space<vmem>>, vector<1x16x16xf32>
    %119 = vector.shape_cast %118 : vector<1x16x16xf32> to vector<16x16xf32>
    %cst_108 = arith.constant dense<0.000000e+00> : vector<16x256xf32>
    %120 = tpu.matmul %119, %117, %cst_108 {dimension_numbers = #tpu.dot_dimension_numbers<[1], [0], [0], [1], [0, 0, 1, 1], [], []>} : vector<16x16xf32>, vector<16x256xf32>, vector<16x256xf32> -> vector<16x256xf32>
    %121 = arith.addf %116, %120 : vector<16x256xf32>
    %c0_109 = arith.constant 0 : index
    %c113_110 = arith.constant 113 : index
    %122 = vector.load %arg5[%c0_109, %c113_110] : memref<16x512xf32, #tpu.memory_space<vmem>>, vector<16x256xf32>
    %123 = arith.mulf %122, %4 : vector<16x256xf32>
    %c20 = arith.constant 20 : index
    %c0_111 = arith.constant 0 : index
    %c0_112 = arith.constant 0 : index
    %124 = vector.load %arg2[%c20, %c0_111, %c0_112] : memref<27x16x16xf32, #tpu.memory_space<vmem>>, vector<1x16x16xf32>
    %125 = vector.shape_cast %124 : vector<1x16x16xf32> to vector<16x16xf32>
    %cst_113 = arith.constant dense<0.000000e+00> : vector<16x256xf32>
    %126 = tpu.matmul %125, %123, %cst_113 {dimension_numbers = #tpu.dot_dimension_numbers<[1], [0], [0], [1], [0, 0, 1, 1], [], []>} : vector<16x16xf32>, vector<16x256xf32>, vector<16x256xf32> -> vector<16x256xf32>
    %127 = arith.addf %121, %126 : vector<16x256xf32>
    %c0_114 = arith.constant 0 : index
    %c127_115 = arith.constant 127 : index
    %128 = vector.load %arg5[%c0_114, %c127_115] : memref<16x512xf32, #tpu.memory_space<vmem>>, vector<16x256xf32>
    %129 = arith.mulf %128, %6 : vector<16x256xf32>
    %c21 = arith.constant 21 : index
    %c0_116 = arith.constant 0 : index
    %c0_117 = arith.constant 0 : index
    %130 = vector.load %arg2[%c21, %c0_116, %c0_117] : memref<27x16x16xf32, #tpu.memory_space<vmem>>, vector<1x16x16xf32>
    %131 = vector.shape_cast %130 : vector<1x16x16xf32> to vector<16x16xf32>
    %cst_118 = arith.constant dense<0.000000e+00> : vector<16x256xf32>
    %132 = tpu.matmul %131, %129, %cst_118 {dimension_numbers = #tpu.dot_dimension_numbers<[1], [0], [0], [1], [0, 0, 1, 1], [], []>} : vector<16x16xf32>, vector<16x256xf32>, vector<16x256xf32> -> vector<16x256xf32>
    %133 = arith.addf %127, %132 : vector<16x256xf32>
    %c0_119 = arith.constant 0 : index
    %c128_120 = arith.constant 128 : index
    %134 = vector.load %arg5[%c0_119, %c128_120] : memref<16x512xf32, #tpu.memory_space<vmem>>, vector<16x256xf32>
    %c22 = arith.constant 22 : index
    %c0_121 = arith.constant 0 : index
    %c0_122 = arith.constant 0 : index
    %135 = vector.load %arg2[%c22, %c0_121, %c0_122] : memref<27x16x16xf32, #tpu.memory_space<vmem>>, vector<1x16x16xf32>
    %136 = vector.shape_cast %135 : vector<1x16x16xf32> to vector<16x16xf32>
    %cst_123 = arith.constant dense<0.000000e+00> : vector<16x256xf32>
    %137 = tpu.matmul %136, %134, %cst_123 {dimension_numbers = #tpu.dot_dimension_numbers<[1], [0], [0], [1], [0, 0, 1, 1], [], []>} : vector<16x16xf32>, vector<16x256xf32>, vector<16x256xf32> -> vector<16x256xf32>
    %138 = arith.addf %133, %137 : vector<16x256xf32>
    %c0_124 = arith.constant 0 : index
    %c129_125 = arith.constant 129 : index
    %139 = vector.load %arg5[%c0_124, %c129_125] : memref<16x512xf32, #tpu.memory_space<vmem>>, vector<16x256xf32>
    %140 = arith.mulf %139, %4 : vector<16x256xf32>
    %c23 = arith.constant 23 : index
    %c0_126 = arith.constant 0 : index
    %c0_127 = arith.constant 0 : index
    %141 = vector.load %arg2[%c23, %c0_126, %c0_127] : memref<27x16x16xf32, #tpu.memory_space<vmem>>, vector<1x16x16xf32>
    %142 = vector.shape_cast %141 : vector<1x16x16xf32> to vector<16x16xf32>
    %cst_128 = arith.constant dense<0.000000e+00> : vector<16x256xf32>
    %143 = tpu.matmul %142, %140, %cst_128 {dimension_numbers = #tpu.dot_dimension_numbers<[1], [0], [0], [1], [0, 0, 1, 1], [], []>} : vector<16x16xf32>, vector<16x256xf32>, vector<16x256xf32> -> vector<16x256xf32>
    %144 = arith.addf %138, %143 : vector<16x256xf32>
    %c0_129 = arith.constant 0 : index
    %c143_130 = arith.constant 143 : index
    %145 = vector.load %arg5[%c0_129, %c143_130] : memref<16x512xf32, #tpu.memory_space<vmem>>, vector<16x256xf32>
    %146 = arith.mulf %145, %6 : vector<16x256xf32>
    %c24 = arith.constant 24 : index
    %c0_131 = arith.constant 0 : index
    %c0_132 = arith.constant 0 : index
    %147 = vector.load %arg2[%c24, %c0_131, %c0_132] : memref<27x16x16xf32, #tpu.memory_space<vmem>>, vector<1x16x16xf32>
    %148 = vector.shape_cast %147 : vector<1x16x16xf32> to vector<16x16xf32>
    %cst_133 = arith.constant dense<0.000000e+00> : vector<16x256xf32>
    %149 = tpu.matmul %148, %146, %cst_133 {dimension_numbers = #tpu.dot_dimension_numbers<[1], [0], [0], [1], [0, 0, 1, 1], [], []>} : vector<16x16xf32>, vector<16x256xf32>, vector<16x256xf32> -> vector<16x256xf32>
    %150 = arith.addf %144, %149 : vector<16x256xf32>
    %c0_134 = arith.constant 0 : index
    %c144_135 = arith.constant 144 : index
    %151 = vector.load %arg5[%c0_134, %c144_135] : memref<16x512xf32, #tpu.memory_space<vmem>>, vector<16x256xf32>
    %c25 = arith.constant 25 : index
    %c0_136 = arith.constant 0 : index
    %c0_137 = arith.constant 0 : index
    %152 = vector.load %arg2[%c25, %c0_136, %c0_137] : memref<27x16x16xf32, #tpu.memory_space<vmem>>, vector<1x16x16xf32>
    %153 = vector.shape_cast %152 : vector<1x16x16xf32> to vector<16x16xf32>
    %cst_138 = arith.constant dense<0.000000e+00> : vector<16x256xf32>
    %154 = tpu.matmul %153, %151, %cst_138 {dimension_numbers = #tpu.dot_dimension_numbers<[1], [0], [0], [1], [0, 0, 1, 1], [], []>} : vector<16x16xf32>, vector<16x256xf32>, vector<16x256xf32> -> vector<16x256xf32>
    %155 = arith.addf %150, %154 : vector<16x256xf32>
    %c0_139 = arith.constant 0 : index
    %c145_140 = arith.constant 145 : index
    %156 = vector.load %arg5[%c0_139, %c145_140] : memref<16x512xf32, #tpu.memory_space<vmem>>, vector<16x256xf32>
    %157 = arith.mulf %156, %4 : vector<16x256xf32>
    %c26 = arith.constant 26 : index
    %c0_141 = arith.constant 0 : index
    %c0_142 = arith.constant 0 : index
    %158 = vector.load %arg2[%c26, %c0_141, %c0_142] : memref<27x16x16xf32, #tpu.memory_space<vmem>>, vector<1x16x16xf32>
    %159 = vector.shape_cast %158 : vector<1x16x16xf32> to vector<16x16xf32>
    %cst_143 = arith.constant dense<0.000000e+00> : vector<16x256xf32>
    %160 = tpu.matmul %159, %157, %cst_143 {dimension_numbers = #tpu.dot_dimension_numbers<[1], [0], [0], [1], [0, 0, 1, 1], [], []>} : vector<16x16xf32>, vector<16x256xf32>, vector<16x256xf32> -> vector<16x256xf32>
    %161 = arith.addf %155, %160 : vector<16x256xf32>
    %162 = arith.negf %161 : vector<16x256xf32>
    %163 = math.exp %162 : vector<16x256xf32>
    %cst_144 = arith.constant 1.000000e+00 : f32
    %164 = vector.broadcast %cst_144 : f32 to vector<16x256xf32>
    %165 = arith.addf %164, %163 : vector<16x256xf32>
    %166 = arith.divf %164, %165 : vector<16x256xf32>
    %167 = arith.mulf %161, %166 : vector<16x256xf32>
    %c0_145 = arith.constant 0 : index
    %c0_146 = arith.constant 0 : index
    %c0_147 = arith.constant 0 : index
    %168 = vector.load %arg4[%c0_145, %c0_146, %c0_147] : memref<1x16x256xf32, #tpu.memory_space<vmem>>, vector<1x16x256xf32>
    %169 = vector.shape_cast %168 : vector<1x16x256xf32> to vector<16x256xf32>
    %170 = vector.shape_cast %167 : vector<16x256xf32> to vector<1x16x256xf32>
    tpu.vector_store %arg4[%c0_145, %c0_146, %c0_147], %170 {strides = array<i32>} : memref<1x16x256xf32, #tpu.memory_space<vmem>>, vector<1x16x256xf32>,
    return
  }
  func.func @transform_0(%arg0: i32) -> (i32, i32, i32) {
    %c0_i32 = arith.constant 0 : i32
    %c0_i32_0 = arith.constant 0 : i32
    %c0_i32_1 = arith.constant 0 : i32
    return %arg0, %c0_i32, %c0_i32_0 : i32, i32, i32
  }
  func.func @transform_1(%arg0: i32) -> (i32, i32, i32) {
    %c0_i32 = arith.constant 0 : i32
    %c0_i32_0 = arith.constant 0 : i32
    %c0_i32_1 = arith.constant 0 : i32
    %c0_i32_2 = arith.constant 0 : i32
    return %c0_i32, %c0_i32_0, %c0_i32_1 : i32, i32, i32
  }
  func.func @transform_2(%arg0: i32) -> (i32, i32, i32) {
    %c0_i32 = arith.constant 0 : i32
    %c0_i32_0 = arith.constant 0 : i32
    %c0_i32_1 = arith.constant 0 : i32
    %c0_i32_2 = arith.constant 0 : i32
    return %c0_i32, %c0_i32_0, %c0_i32_1 : i32, i32, i32
  }
  func.func @transform_3(%arg0: i32) -> (i32, i32, i32) {
    %c0_i32 = arith.constant 0 : i32
    %c0_i32_0 = arith.constant 0 : i32
    %c0_i32_1 = arith.constant 0 : i32
    return %arg0, %c0_i32, %c0_i32_0 : i32, i32, i32
  }
}

</mosaic_0001>

<bundles_post_ra>
// kernel: model_forward.1
= control target key start
LH: loop header
LB: loop body
LE: loop exit
PB: predicated region body
PF: predicated region fallthrough
CT: control target
= control target key end

     0   :  { %s3803_s12 = smov 0   ;;  %s4897_s0 = inlined_call_operand.vmem [shape: f32[2,16,256], index: 0, kind: input, shape index: {}]   ;;  %s4898_s1 = inlined_call_operand.vmem [shape: f32[27,16,16], index: 1, kind: input, shape index: {}]   ;;  %s4899_s2 = inlined_call_operand.vmem [shape: f32[2,16,256], index: 2, kind: input, shape index: {}]   ;;  %s4900_s3 = inlined_call_operand.vmem [shape: f32[2,16,256], index: 3, kind: output, shape index: {}]  }
   0x1 LB: > { %s3572_s13 = sadd.s32 4294967295, %s3772_s12   ;;  %p3576_p0 = scmp.ge.s32.totalorder %s3772_s12, 1  ;;  %s3772_s12 = sphi %s3803_s12, %s13_s12  }
   0x2   : > { %p137_p1 = scmp.lt.s32.totalorder %s3772_s12, 3 }
   0x4   : > { %p138_p2 = pnand %p3576_p0, %p137_p1 }
   0x6   : > { %141 = sbr.rel (%p138_p2) target bundleno = 1333 (0x535), region = 32 }
   0xb   : > { %v3583_v0 = vld [vmem:[%s4899_s2 + $0x30] sm:$0xff]  ;;  %v3581_v1 = vld [vmem:[%s4899_s2 + $0x20] sm:$0xff]  ;;  %s3774_s18 = smov 111   ;;  %v3584_v2 = vld [vmem:[%s4899_s2 + $0x38] sm:$0xff]  ;;  %v4901_v4 = vmov 0.0   ;;  %s3776_s27 = smov 113  }
   0xc   : > { %206 = vrot.lane.b32.xlu0 %v3583_v0, %s3774_s18  ;;  %202 = vrot.lane.b32.xlu1 %v3581_v1, %s3774_s18  ;;  %v3582_v3 = vld [vmem:[%s4899_s2 + $0x28] sm:$0xff]  ;;  %v178_v5 = vld [vmem:[%s4899_s2 + $0x18] sm:$0xff]  ;;  %s3777_s5 = smov 127   ;;  %s3778_s6 = smov 1   ;;  %vm210_vm0 = vcmask 908288   ;;  %vm462_vm1 = vcmask 924672  }
   0xd   : > { %327 = vmatprep.mubr.f32.mxu0 %v4901_v4  ;;  %333 = vmatprep.mubr.f32.mxu1 %v4901_v4  ;;  %v177_v6 = vld [vmem:[%s4899_s2 + $0x10] sm:$0xff]  ;;  %v176_v7 = vld [vmem:[%s4899_s2 + $0x8] sm:$0xff]  ;;  %v175_v8 = vld [vmem:[%s4899_s2] sm:$0xff]  ;;  %p161_p3 = scmp.lt.s32.totalorder %s3572_s13, 1  ;;  %s3779_s7 = smov 15   ;;  %vm248_vm2 = vcmask 130048  }
   0xe   : > { %s3780_s9 = smov 17   ;;  %s3781_s15 = smov 16   ;;  %vm602_vm3 = vcmask 1039360   ;;  %vm638_vm4 = vcmask 7168   ;;  %vm498_vm5 = vcmask 121856   ;;  %vm358_vm6 = vcmask 138240  }
   0xf   : > { %s4948_s13 = smov (!%p161_p3, %s3572_s13), 1  ;;  %s3782_s16 = smov 112   ;;  %vm1127_vm7 = vcmask 916480  }
  0x10   : > { %208 = vrot.lane.b32.xlu0 %v3584_v2, %s3774_s18  ;;  %204 = vrot.lane.b32.xlu1 %v3582_v3, %s3774_s18  ;;  %s3697_s8 = sshll.u32 %s4948_s13, 5 }
  0x11   : > { %s165_s14 = scalar_lea.vmem %s4897_s0, %s3697_s8  ;;  %s170_s11 = scalar_lea.vmem %s4900_s3, %s3697_s8 }
  0x12   : > { %v3873_v9 = vld [vmem:[%s165_s14 + $0x10] sm:$0xff]  ;;  %v3875_v10 = vld [vmem:[%s165_s14 + $0x18] sm:$0xff]  ;;  %v3881_v11 = vld [vmem:[%s165_s14] sm:$0xff] }
  0x13   : > { %v3887_v12 = vld [vmem:[%s165_s14 + $0x8] sm:$0xff] }
  0x14   : > { %460 = vrot.lane.b32.xlu1 %v178_v5, %s3776_s27  ;;  %458 = vrot.lane.b32.xlu0 %v177_v6, %s3776_s27 }
  0x18   : > { %456 = vrot.lane.b32.xlu1 %v176_v7, %s3776_s27  ;;  %454 = vrot.lane.b32.xlu0 %v175_v8, %s3776_s27 }
  0x1c   : > { %600 = vrot.lane.b32.xlu1 %v3584_v2, %s3777_s5  ;;  %598 = vrot.lane.b32.xlu0 %v3583_v0, %s3777_s5 }
  0x20   : > { %596 = vrot.lane.b32.xlu1 %v3582_v3, %s3777_s5  ;;  %594 = vrot.lane.b32.xlu0 %v3581_v1, %s3777_s5 }
  0x24   : > { %836 = vrot.lane.b32.xlu1 %v178_v5, %s3778_s6  ;;  %834 = vrot.lane.b32.xlu0 %v177_v6, %s3778_s6 }
  0x28   : > { %832 = vrot.lane.b32.xlu1 %v176_v7, %s3778_s6  ;;  %830 = vrot.lane.b32.xlu0 %v175_v8, %s3778_s6 }
  0x2c   : > { %974 = vrot.lane.b32.xlu1 %v3584_v2, %s3779_s7  ;;  %972 = vrot.lane.b32.xlu0 %v3583_v0, %s3779_s7 }
  0x30   : > { %970 = vrot.lane.b32.xlu1 %v3582_v3, %s3779_s7  ;;  %968 = vrot.lane.b32.xlu0 %v3581_v1, %s3779_s7 }
  0x34   : > { %1229 = vrot.lane.b32.xlu1 %v178_v5, %s3780_s9  ;;  %1227 = vrot.lane.b32.xlu0 %v177_v6, %s3780_s9 }
  0x38   : > { %1225 = vrot.lane.b32.xlu1 %v176_v7, %s3780_s9  ;;  %1223 = vrot.lane.b32.xlu0 %v175_v8, %s3780_s9 }
  0x3c   : > { %244 = vrot.lane.b32.xlu0 %v3873_v9, %s3781_s15  ;;  %246 = vrot.lane.b32.xlu1 %v3875_v10, %s3781_s15 }
  0x40   : > { %3721 = vrot.lane.b32.xlu0 %v4901_v4, %s3781_s15  ;;  %238 = vrot.lane.b32.xlu1 %v3881_v11, %s3781_s15 }
  0x44   : > { %240 = vrot.lane.b32.xlu0 %v3887_v12, %s3781_s15 }
  0x7e   : > { %v3891_v13 = vpop.permute.xlu0 %206  ;;  %v203_v14 = vpop.permute.xlu1 %202 }
  0x7f   : > { %v3894_v15 = vmul.f32 0.0, %v3891_v13  ;;  %v3910_v22 = vmul.f32 0.0, %v203_v14 }
  0x81   : > { %4919 = vst [vmem:[#allocation3_spill] sm:$0xff] %v3894_v15  ;;  %352 = vrot.lane.b32.xlu1 %v3894_v15, %s3780_s9  ;;  %4920 = vst [vmem:[#allocation4_spill] sm:$0xff] %v3910_v22 }
  0x82   : > { %v3898_v16 = vpop.permute.xlu0 %208  ;;  %v3900_v17 = vpop.permute.xlu1 %204 }
  0x83   : > { %v224_v18 = vmul.f32 %v3898_v16, %v3875_v10  ;;  %v221_v19 = vmul.f32 %v3900_v17, %v3887_v12  ;;  %v3984_v51 = vsel %vm210_vm0, %v203_v14, %v3900_v17  ;;  %v4019_v62 = vsel %vm210_vm0, %v3891_v13, %v3898_v16 }
  0x84   : > { %v220_v55 = vmul.f32 %v3984_v51, %v3881_v11  ;;  %v223_v1 = vmul.f32 %v4019_v62, %v3873_v9 }
  0x85   : > { %356 = vrot.lane.b32.xlu0 %v224_v18, %s3780_s9  ;;  %350 = vrot.lane.b32.xlu1 %v221_v19, %s3780_s9 }
  0x86   : > { %v3908_v20 = vpop.permute.xlu1 %460  ;;  %v459_v21 = vpop.permute.xlu0 %458 }
  0x87   : > { %v476_v23 = vmul.f32 %v3908_v20, %v3875_v10  ;;  %v3919_v26 = vmul.f32 0.0, %v459_v21  ;;  %v3999_v56 = vsel %vm462_vm1, %v459_v21, %v3908_v20 }
  0x88   : > { %v475_v60 = vmul.f32 %v3999_v56, %v3873_v9 }
  0x89   : > { %346 = vrot.lane.b32.xlu0 %v3910_v22, %s3780_s9  ;;  %496 = vrot.lane.b32.xlu1 %v476_v23, %s3779_s7  ;;  %4921 = vst [vmem:[#allocation5_spill] sm:$0xff] %v3919_v26 }
  0x8a   : > { %v3917_v24 = vpop.permute.xlu1 %456  ;;  %v455_v25 = vpop.permute.xlu0 %454 }
  0x8b   : > { %v3921_v27 = vmul.f32 0.0, %v455_v25  ;;  %v473_v28 = vmul.f32 %v3917_v24, %v3887_v12  ;;  %v4014_v61 = vsel %vm462_vm1, %v455_v25, %v3917_v24 }
  0x8c   : > { %v472_v2 = vmul.f32 %v4014_v61, %v3881_v11 }
  0x8d   : > { %4922 = vst [vmem:[#allocation6_spill] sm:$0xff] %v3921_v27  ;;  %486 = vrot.lane.b32.xlu0 %v3921_v27, %s3779_s7  ;;  %492 = vrot.lane.b32.xlu1 %v3919_v26, %s3779_s7 }
  0x8e   : > { %v3929_v29 = vpop.permute.xlu1 %600  ;;  %v3931_v30 = vpop.permute.xlu0 %598 }
  0x8f   : > { %v616_v31 = vmul.f32 %v3929_v29, %v3875_v10  ;;  %v3940_v34 = vmul.f32 0.0, %v3931_v30  ;;  %v4040_v14 = vsel %vm602_vm3, %v3931_v30, %v3929_v29 }
  0x90   : > { %v615_v25 = vmul.f32 %v4040_v14, %v3873_v9 }
  0x91   : > { %636 = vrot.lane.b32.xlu0 %v616_v31, %s3778_s6  ;;  %490 = vrot.lane.b32.xlu1 %v473_v28, %s3779_s7  ;;  %4923 = vst [vmem:[#allocation7_spill] sm:$0xff] %v3940_v34 }
  0x92   : > { %v3937_v32 = vpop.permute.xlu1 %596  ;;  %v595_v33 = vpop.permute.xlu0 %594 }
  0x93   : > { %v3942_v35 = vmul.f32 0.0, %v595_v33  ;;  %v613_v36 = vmul.f32 %v3937_v32, %v3887_v12  ;;  %v4031_v5 = vsel %vm602_vm3, %v595_v33, %v3937_v32 }
  0x94   : > { %v612_v7 = vmul.f32 %v4031_v5, %v3881_v11 }
  0x95   : > { %4924 = vst [vmem:[#allocation8_spill] sm:$0xff] %v3942_v35  ;;  %626 = vrot.lane.b32.xlu0 %v3942_v35, %s3778_s6  ;;  %632 = vrot.lane.b32.xlu1 %v3940_v34, %s3778_s6 }
  0x96   : > { %v3950_v37 = vpop.permute.xlu1 %836  ;;  %v3952_v38 = vpop.permute.xlu0 %834 }
  0x97   : > { %v3955_v39 = vmul.f32 0.0, %v3950_v37  ;;  %v849_v42 = vmul.f32 %v3952_v38, %v3873_v9  ;;  %v4059_v33 = vsel %vm638_vm4, %v3952_v38, %v3950_v37 }
  0x98   : > { %v850_v37 = vmul.f32 %v4059_v33, %v3875_v10 }
  0x99   : > { %4925 = vst [vmem:[#allocation9_spill] sm:$0xff] %v3955_v39  ;;  %871 = vrot.lane.b32.xlu0 %v3955_v39, %s3777_s5  ;;  %630 = vrot.lane.b32.xlu1 %v613_v36, %s3778_s6 }
  0x9a   : > { %v833_v40 = vpop.permute.xlu1 %832  ;;  %v3960_v41 = vpop.permute.xlu0 %830 }
  0x9b   : > { %v846_v43 = vmul.f32 %v3960_v41, %v3881_v11  ;;  %v3966_v44 = vmul.f32 0.0, %v833_v40  ;;  %v4044_v18 = vsel %vm638_vm4, %v3960_v41, %v833_v40  ;;  %v3585_v40 = vld [vmem:[%s4898_s1 + $0x10] sm:$0xff] }
  0x9c   : > { %v847_v28 = vmul.f32 %v4044_v18, %v3887_v12 }
  0x9d   : > { %4926 = vst [vmem:[#allocation10_spill] sm:$0xff] %v3966_v44  ;;  %867 = vrot.lane.b32.xlu1 %v849_v42, %s3777_s5  ;;  %861 = vrot.lane.b32.xlu0 %v846_v43, %s3777_s5  ;;  %v3586_v42 = vld [vmem:[%s4898_s1 + $0x18] sm:$0xff] }
  0x9e   : > { %v975_v45 = vpop.permute.xlu1 %974  ;;  %v3970_v46 = vpop.permute.xlu0 %972 }
  0x9f   : > { %v3972_v47 = vmul.f32 0.0, %v975_v45  ;;  %v987_v54 = vmul.f32 %v3970_v46, %v3873_v9  ;;  %v4063_v36 = vsel %vm498_vm5, %v3970_v46, %v975_v45 }
  0xa0   : > { %v988_v43 = vmul.f32 %v4063_v36, %v3875_v10 }
  0xa1   : > { %4927 = vst [vmem:[#allocation11_spill] sm:$0xff] %v3972_v47  ;;  %865 = vrot.lane.b32.xlu1 %v3966_v44, %s3777_s5 }
  0xa2   : > { %v3976_v48 = vpop.permute.xlu1 %970  ;;  %v3978_v49 = vpop.permute.xlu0 %968 }
  0xa3   : > { %v984_v50 = vmul.f32 %v3978_v49, %v3881_v11  ;;  %v4002_v57 = vmul.f32 0.0, %v3976_v48  ;;  %v4082_v45 = vsel %vm498_vm5, %v3978_v49, %v3976_v48 }
  0xa5   : > { %1009 = vrot.lane.b32.xlu1 %v3972_v47, %s3776_s27  ;;  %999 = vrot.lane.b32.xlu0 %v984_v50, %s3776_s27  ;;  %4929 = vst [vmem:[#allocation13_spill] sm:$0xff] %v4002_v57 }
  0xa6   : > { %v3989_v52 = vpop.permute.xlu1 %1229  ;;  %v3991_v53 = vpop.permute.xlu0 %1227 }
  0xa7   : > { %4928 = vst [vmem:[#allocation12_spill] sm:$0xff] %v3991_v53  ;;  %v4091_v50 = vsel %vm358_vm6, %v3991_v53, %v3989_v52 }
  0xa8   : > { %v1243_v48 = vmul.f32 %v4091_v50, %v3875_v10 }
  0xa9   : > { %1005 = vrot.lane.b32.xlu1 %v987_v54, %s3776_s27  ;;  %348 = vrot.lane.b32.xlu0 %v220_v55, %s3780_s9  ;;  %v985_v54 = vmul.f32 %v4082_v45, %v3887_v12 }
  0xaa   : > { %v4006_v58 = vpop.permute.xlu1 %1225  ;;  %v4008_v59 = vpop.permute.xlu0 %1223 }
  0xab   : > { %4930 = vst [vmem:[#allocation14_spill] sm:$0xff] %v4008_v59  ;;  %v4106_v55 = vsel %vm358_vm6, %v4008_v59, %v4006_v58 }
  0xad   : > { %1003 = vrot.lane.b32.xlu1 %v4002_v57, %s3776_s27  ;;  %494 = vrot.lane.b32.xlu0 %v475_v60, %s3779_s7  ;;  %v1240_v60 = vmul.f32 %v4106_v55, %v3887_v12 }
  0xae   : > { %v245_v63 = vpop.permute.xlu0 %244  ;;  %v247_v0 = vpop.permute.xlu1 %246 }
  0xaf   : > { %v252_v3 = vsel %vm248_vm2, %v245_v63, %v247_v0  ;;  %v1239_v0 = vmul.f32 %v4008_v59, %v3881_v11 }
  0xb0   : > { %291 = vmatprep.subr.mxu0 %v252_v3  ;;  %3699 = vmatprep.subr.mxu1 %v252_v3 }
  0xb1   : > { %354 = vrot.lane.b32.xlu1 %v223_v1, %s3780_s9  ;;  %488 = vrot.lane.b32.xlu0 %v472_v2, %s3779_s7  ;;  %v1242_v1 = vmul.f32 %v3991_v53, %v3873_v9  ;;  %v4127_v2 = vmul.f32 0.0, %v4006_v58 }
  0xb2   : > { %v3722_v6 = vpop.permute.xlu0 %3721  ;;  %v239_v21 = vpop.permute.xlu1 %238 }
  0xb3   : > { %v3724_v8 = vunpack.i.h.bf16 %v3722_v6  ;;  %v3723_v13 = vunpack.i.l.bf16 %v3722_v6  ;;  %4931 = vst [vmem:[#allocation15_spill] sm:$0xff] %v4127_v2 }
  0xb5   : > { %1123 = vrot.lane.b32.xlu1 %v3875_v10, %s3782_s16  ;;  %628 = vrot.lane.b32.xlu0 %v612_v7, %s3778_s6  ;;  %v251_v19 = vsel %vm248_vm2, %v3723_v13, %v245_v63  ;;  %v249_v31 = vsel %vm248_vm2, %v3724_v8, %v239_v21  ;;  %v4115_v63 = vmul.f32 0.0, %v3989_v52 }
  0xb6   : > { %292 = vmatpush1.msra.mxu0 %v251_v19  ;;  %3701 = vmatpush1.msra.mxu1 %v251_v19  ;;  %v241_v23 = vpop.permute.xlu0 %240 }
  0xb7   : > { %v250_v30 = vsel %vm248_vm2, %v239_v21, %v241_v23 }
  0xb8   : > { %293 = vmatprep.subr.mxu0 %v250_v30  ;;  %3700 = vmatprep.subr.mxu1 %v250_v30 }
  0xb9   : > { %634 = vrot.lane.b32.xlu1 %v615_v25, %s3778_s6  ;;  %863 = vrot.lane.b32.xlu0 %v847_v28, %s3777_s5 }
  0xba   : > { %294 = vmatpush1.msra.mxu0 %v249_v31  ;;  %3702 = vmatpush1.msra.mxu1 %v249_v31 }
  0xbb   : > { %3587 = vmatmul.mubr.msk.f32.vlgmr.msra.gmra.mxu0 %vm248_vm2, %v3585_v40  ;;  %3588 = vmatmul.mubr.msk.f32.vlgmr.msra.gmra.mxu1 %vm248_vm2, %v3586_v42 }
  0xbc   : > { %437 = vmatprep.mubr.f32.mxu1 %v4901_v4  ;;  %577 = vmatprep.mubr.f32.mxu0 %v4901_v4 }
  0xbd   : > { %869 = vrot.lane.b32.xlu1 %v850_v37, %s3777_s5  ;;  %1007 = vrot.lane.b32.xlu0 %v988_v43, %s3776_s27 }
  0xc1   : > { %1121 = vrot.lane.b32.xlu1 %v3873_v9, %s3782_s16  ;;  %1001 = vrot.lane.b32.xlu0 %v985_v54, %s3776_s27 }
  0xc5   : > { %1262 = vrot.lane.b32.xlu1 %v1243_v48, %s3774_s18  ;;  %3726 = vrot.lane.b32.xlu0 %v4901_v4, %s3782_s16 }
  0xc9   : > { %1115 = vrot.lane.b32.xlu1 %v3881_v11, %s3782_s16  ;;  %1117 = vrot.lane.b32.xlu0 %v3887_v12, %s3782_s16 }
  0xcd   : > { %1256 = vrot.lane.b32.xlu1 %v1240_v60, %s3774_s18  ;;  %1264 = vrot.lane.b32.xlu0 %v4115_v63, %s3774_s18 }
  0xd1   : > { %1254 = vrot.lane.b32.xlu1 %v1239_v0, %s3774_s18  ;;  %1260 = vrot.lane.b32.xlu0 %v1242_v1, %s3774_s18 }
  0xd5   : > { %1504 = vrot.lane.b32.xlu1 %v3894_v15, %s3780_s9  ;;  %1258 = vrot.lane.b32.xlu0 %v4127_v2, %s3774_s18 }
  0xd9   : > { %1622 = vrot.lane.b32.xlu1 %v3919_v26, %s3779_s7  ;;  %3731 = vrot.lane.b32.xlu0 %v4901_v4, %s3781_s15 }
  0xdd   : > { %1744 = vrot.lane.b32.xlu1 %v3940_v34, %s3778_s6  ;;  %1498 = vrot.lane.b32.xlu0 %v3910_v22, %s3780_s9  ;;  %v3591_v22 = vld [vmem:[%s4898_s1 + $0x20] sm:$0xff] }
  0xe1   : > { %1960 = vrot.lane.b32.xlu1 %v3966_v44, %s3777_s5  ;;  %1616 = vrot.lane.b32.xlu0 %v3921_v27, %s3779_s7 }
  0xe5   : > { %2088 = vrot.lane.b32.xlu1 %v3972_v47, %s3776_s27  ;;  %1738 = vrot.lane.b32.xlu0 %v3942_v35, %s3778_s6 }
  0xe9   : > { %2082 = vrot.lane.b32.xlu1 %v4002_v57, %s3776_s27  ;;  %1966 = vrot.lane.b32.xlu0 %v3955_v39, %s3777_s5 }
  0xf3   : > { %v353_v52 = vpop.permute.xlu1 %352 }
  0xf7   : > { %v357_v58 = vpop.permute.xlu0 %356  ;;  %v351_v3 = vpop.permute.xlu1 %350 }
  0xfb   : > { %v347_v6 = vpop.permute.xlu0 %346  ;;  %v497_v7 = vpop.permute.xlu1 %496 }
  0xff   : > { %v487_v8 = vpop.permute.xlu0 %486  ;;  %v493_v13 = vpop.permute.xlu1 %492 }
 0x103   : > { %v637_v19 = vpop.permute.xlu0 %636  ;;  %v491_v21 = vpop.permute.xlu1 %490 }
 0x107   : > { %v627_v23 = vpop.permute.xlu0 %626  ;;  %v633_v25 = vpop.permute.xlu1 %632 }
 0x10b   : > { %v631_v28 = vpop.permute.xlu1 %630  ;;  %v872_v30 = vpop.permute.xlu0 %871 }
 0x10f   : > { %v4153_v31 = vpop.permute.xlu1 %867  ;;  %v4155_v40 = vpop.permute.xlu0 %861 }
 0x113   : > { %v4157_v42 = vpop.permute.xlu1 %865 }
 0x117   : > { %v1010_v37 = vpop.permute.xlu1 %1009  ;;  %v4159_v43 = vpop.permute.xlu0 %999 }
 0x11b   : > { %v1006_v54 = vpop.permute.xlu1 %1005  ;;  %v349_v48 = vpop.permute.xlu0 %348 }
 0x11f   : > { %v4161_v60 = vpop.permute.xlu1 %1003  ;;  %v495_v0 = vpop.permute.xlu0 %494 }
 0x120   : > { %v502_v1 = vsel %vm498_vm5, %v495_v0, %v497_v7  ;;  %v501_v4 = vsel %vm498_vm5, %v493_v13, %v495_v0 }
 0x121   : > { %541 = vmatprep.subr.mxu0 %v502_v1  ;;  %v3607_v1 = vld [vmem:[%s4898_s1 + $0x60] sm:$0xff] }
 0x122   : > { %542 = vmatpush1.msra.mxu0 %v501_v4  ;;  %v360_v4 = vsel %vm358_vm6, %v349_v48, %v351_v3 }
 0x123   : > { %v355_v39 = vpop.permute.xlu1 %354  ;;  %v489_v57 = vpop.permute.xlu0 %488 }
 0x124   : > { %v362_v35 = vsel %vm358_vm6, %v355_v39, %v357_v58  ;;  %v500_v47 = vsel %vm498_vm5, %v489_v57, %v491_v21  ;;  %v361_v27 = vsel %vm358_vm6, %v353_v52, %v355_v39  ;;  %v499_v44 = vsel %vm498_vm5, %v487_v8, %v489_v57  ;;  %v225_v58 = vld [vmem:[%s4898_s1] sm:$0xff] }
 0x125   : > { %401 = vmatprep.subr.mxu1 %v362_v35  ;;  %543 = vmatprep.subr.mxu0 %v500_v47  ;;  %v359_v57 = vsel %vm358_vm6, %v347_v6, %v349_v48  ;;  %v4932_v52 = vmov 0.0   ;;  %v226_v35 = vld [vmem:[%s4898_s1 + $0x8] sm:$0xff] }
 0x126   : > { %402 = vmatpush1.msra.mxu1 %v361_v27  ;;  %544 = vmatpush1.msra.mxu0 %v499_v44  ;;  %v3592_v27 = vld [vmem:[%s4898_s1 + $0x28] sm:$0xff] }
 0x127   : > { %v4176_v7 = vpop.permute.xlu1 %1123  ;;  %403 = vmatprep.subr.mxu1 %v360_v4  ;;  %v629_v39 = vpop.permute.xlu0 %628  ;;  %3593 = vmatmul.mubr.msk.f32.vlgmr.msra.gmra.mxu0 %vm248_vm2, %v3591_v22  ;;  %v3600_v48 = vld [vmem:[%s4898_s1 + $0x48] sm:$0xff] }
 0x128   : > { %404 = vmatpush1.msra.mxu1 %v359_v57  ;;  %583 = vmatprep.mubr.f32.mxu0 %v4932_v52  ;;  %v639_v8 = vsel %vm638_vm4, %v627_v23, %v629_v39 }
 0x129   : > { %3589 = vmatmul.mubr.msk.f32.vlgmr.msra.gmra.mxu1 %vm248_vm2, %v225_v58  ;;  %771 = vmatprep.subr.mxu0 %v3875_v10  ;;  %v3599_v10 = vld [vmem:[%s4898_s1 + $0x40] sm:$0xff] }
 0x12a   : > { %443 = vmatprep.mubr.f32.mxu1 %v4932_v52  ;;  %772 = vmatpush1.msra.mxu0 %v3873_v9  ;;  %v640_v9 = vsel %vm638_vm4, %v629_v39, %v631_v28  ;;  %v3596_v28 = vld [vmem:[%s4898_s1 + $0x38] sm:$0xff] }
 0x12b   : > { %v635_v22 = vpop.permute.xlu1 %634  ;;  %v864_v44 = vpop.permute.xlu0 %863  ;;  %3594 = vmatmul.mubr.msk.f32.gmra.mxu0 %vm248_vm2, %v3592_v27  ;;  %773 = vmatprep.subr.mxu0 %v3887_v12  ;;  %v3595_v12 = vld [vmem:[%s4898_s1 + $0x30] sm:$0xff]  ;;  %v3604_v39 = vld [vmem:[%s4898_s1 + $0x58] sm:$0xff] }
 0x12c   : > { %v642_v47 = vsel %vm638_vm4, %v635_v22, %v637_v19  ;;  %v641_v3 = vsel %vm638_vm4, %v633_v25, %v635_v22  ;;  %774 = vmatpush1.msra.mxu0 %v3881_v11  ;;  %807 = vmatprep.mubr.f32.mxu0 %v4932_v52  ;;  %v874_v23 = vsel %vm602_vm3, %v864_v44, %v4157_v42 }
 0x12d   : > { %3590 = vmatmul.mubr.msk.f32.gmra.mxu1 %vm248_vm2, %v226_v35  ;;  %681 = vmatprep.subr.mxu1 %v642_v47  ;;  %v3608_v47 = vld [vmem:[%s4898_s1 + $0x68] sm:$0xff] }
 0x12e   : > { %682 = vmatpush1.msra.mxu1 %v641_v3  ;;  %717 = vmatprep.mubr.f32.mxu1 %v4932_v52 }
 0x12f   : > { %v870_v6 = vpop.permute.xlu1 %869  ;;  %683 = vmatprep.subr.mxu1 %v640_v9  ;;  %v1008_v11 = vpop.permute.xlu0 %1007  ;;  %3601 = vmatmul.mubr.msk.f32.vlgmr.msra.gmra.mxu0 %vm248_vm2, %v3599_v10 }
 0x130   : > { %684 = vmatpush1.msra.mxu1 %v639_v8  ;;  %v876_v13 = vsel %vm602_vm3, %v870_v6, %v872_v30  ;;  %v1014_v19 = vsel %vm462_vm1, %v1008_v11, %v1010_v37  ;;  %v875_v21 = vsel %vm602_vm3, %v4153_v31, %v870_v6  ;;  %v1013_v25 = vsel %vm462_vm1, %v1006_v54, %v1008_v11 }
 0x131   : > { %3597 = vmatmul.mubr.msk.f32.vlgmr.msra.gmra.mxu1 %vm248_vm2, %v3595_v12  ;;  %915 = vmatprep.subr.mxu1 %v876_v13  ;;  %v873_v31 = vsel %vm602_vm3, %v4155_v40, %v864_v44  ;;  %v3603_v40 = vld [vmem:[%s4898_s1 + $0x50] sm:$0xff]  ;;  %v3612_v12 = vld [vmem:[%s4898_s1 + $0x78] sm:$0xff] }
 0x132   : > { %1053 = vmatprep.subr.mxu0 %v1014_v19  ;;  %916 = vmatpush1.msra.mxu1 %v875_v21  ;;  %v3615_v21 = vld [vmem:[%s4898_s1 + $0x80] sm:$0xff] }
 0x133   : > { %1054 = vmatpush1.msra.mxu0 %v1013_v25  ;;  %v1122_v30 = vpop.permute.xlu1 %1121  ;;  %917 = vmatprep.subr.mxu1 %v874_v23  ;;  %v1002_v37 = vpop.permute.xlu0 %1001  ;;  %v3616_v23 = vld [vmem:[%s4898_s1 + $0x88] sm:$0xff] }
 0x134   : > { %723 = vmatprep.mubr.f32.mxu1 %v4932_v52  ;;  %918 = vmatpush1.msra.mxu1 %v873_v31  ;;  %v1012_v54 = vsel %vm462_vm1, %v1002_v37, %v4161_v60  ;;  %v1011_v42 = vsel %vm462_vm1, %v4159_v43, %v1002_v37  ;;  %v1130_v57 = vsel %vm1127_vm7, %v1122_v30, %v4176_v7 }
 0x135   : > { %3598 = vmatmul.mubr.msk.f32.gmra.mxu1 %vm248_vm2, %v3596_v28  ;;  %1055 = vmatprep.subr.mxu0 %v1012_v54 }
 0x136   : > { %813 = vmatprep.mubr.f32.mxu0 %v4932_v52  ;;  %1056 = vmatpush1.msra.mxu0 %v1011_v42 }
 0x137   : > { %v1263_v0 = vpop.permute.xlu1 %1262  ;;  %3602 = vmatmul.mubr.msk.f32.gmra.mxu0 %vm248_vm2, %v3600_v48  ;;  %v3727_v60 = vpop.permute.xlu0 %3726  ;;  %951 = vmatprep.mubr.f32.mxu1 %v4932_v52 }
 0x138   : > { %v3728_v43 = vunpack.i.l.bf16 %v3727_v60  ;;  %1089 = vmatprep.mubr.f32.mxu0 %v4932_v52  ;;  %v3729_v4 = vunpack.i.h.bf16 %v3727_v60 }
 0x139   : > { %3605 = vmatmul.mubr.msk.f32.vlgmr.msra.gmra.mxu1 %vm248_vm2, %v3603_v40 }
 0x13a   : > { %v1131_v58 = vsel %vm1127_vm7, %v4176_v7, %v3728_v43  ;;  %957 = vmatprep.mubr.f32.mxu1 %v4932_v52  ;;  %v3611_v7 = vld [vmem:[%s4898_s1 + $0x70] sm:$0xff] }
 0x13b   : > { %v1116_v27 = vpop.permute.xlu1 %1115  ;;  %3609 = vmatmul.mubr.msk.f32.vlgmr.msra.gmra.mxu0 %vm248_vm2, %v3607_v1  ;;  %v1118_v35 = vpop.permute.xlu0 %1117  ;;  %1170 = vmatprep.subr.mxu1 %v1131_v58 }
 0x13c   : > { %1171 = vmatpush1.msra.mxu1 %v1130_v57  ;;  %v1129_v22 = vsel %vm1127_vm7, %v1118_v35, %v3729_v4  ;;  %1095 = vmatprep.mubr.f32.mxu0 %v4932_v52  ;;  %v1128_v44 = vsel %vm1127_vm7, %v1116_v27, %v1118_v35 }
 0x13d   : > { %3606 = vmatmul.mubr.msk.f32.gmra.mxu1 %vm248_vm2, %v3604_v39  ;;  %1172 = vmatprep.subr.mxu1 %v1129_v22 }
 0x13e   : > { %1173 = vmatpush1.msra.mxu1 %v1128_v44  ;;  %1206 = vmatprep.mubr.f32.mxu1 %v4932_v52 }
 0x13f   : > { %3610 = vmatmul.mubr.msk.f32.gmra.mxu0 %vm248_vm2, %v3608_v47  ;;  %v1265_v3 = vpop.permute.xlu0 %1264  ;;  %v1257_v10 = vpop.permute.xlu1 %1256 }
 0x140   : > { %v1269_v9 = vsel %vm210_vm0, %v1263_v0, %v1265_v3  ;;  %1344 = vmatprep.mubr.f32.mxu0 %v4932_v52 }
 0x141   : > { %3613 = vmatmul.mubr.msk.f32.vlgmr.msra.gmra.mxu1 %vm248_vm2, %v3611_v7  ;;  %1308 = vmatprep.subr.mxu0 %v1269_v9 }
 0x142   : > { %1212 = vmatprep.mubr.f32.mxu1 %v4932_v52 }
 0x143   : > { %v1261_v6 = vpop.permute.xlu0 %1260  ;;  %v1255_v8 = vpop.permute.xlu1 %1254 }
 0x144   : > { %v1268_v11 = vsel %vm210_vm0, %v1261_v6, %v1263_v0  ;;  %v1266_v25 = vsel %vm210_vm0, %v1255_v8, %v1257_v10 }
 0x145   : > { %3614 = vmatmul.mubr.msk.f32.gmra.mxu1 %vm248_vm2, %v3612_v12  ;;  %1309 = vmatpush1.msra.mxu0 %v1268_v11 }
 0x146   : > { %1479 = vmatprep.mubr.f32.mxu1 %v4932_v52 }
 0x147   : > { %v1259_v13 = vpop.permute.xlu0 %1258 }
 0x148   : > { %v1267_v19 = vsel %vm210_vm0, %v1257_v10, %v1259_v13 }
 0x149   : > { %1310 = vmatprep.subr.mxu0 %v1267_v19 }
 0x14a   : > { %1311 = vmatpush1.msra.mxu0 %v1266_v25 }
 0x14b   : > { %3617 = vmatmul.mubr.msk.f32.vlgmr.msra.gmra.mxu0 %vm248_vm2, %v3615_v21 }
 0x14c   : > { %1350 = vmatprep.mubr.f32.mxu0 %v4932_v52 }
 0x14f   : > { %3618 = vmatmul.mubr.msk.f32.gmra.mxu0 %vm248_vm2, %v3616_v23 }
 0x150   : > { %1588 = vmatprep.mubr.f32.mxu0 %v4932_v52 }
 0x17b   : > { %v329_v28 = vpop.f32.mrf.mxu0  ;;  %v335_v30 = vpop.f32.mrf.mxu1 }
 0x17d   : > { %v331_v37 = vpop.f32.mrf.mxu0  ;;  %v337_v31 = vpop.f32.mrf.mxu1 }
 0x1e7   : > { %v579_v54 = vpop.f32.mrf.mxu0 }
 0x1e9   : > { %v439_v42 = vpop.f32.mrf.mxu1  ;;  %v581_v48 = vpop.f32.mrf.mxu0 }
 0x1ea   : > { %v440_v35 = vadd.f32 %v439_v42, %v329_v28 }
 0x1eb   : > { %v441_v40 = vpop.f32.mrf.mxu1  ;;  %v585_v0 = vpop.f32.mrf.mxu0 }
 0x1ec   : > { %v442_v47 = vadd.f32 %v441_v40, %v331_v37  ;;  %v590_v10 = vadd.f32 %v579_v54, %v440_v35 }
 0x1ed   : > { %v445_v60 = vpop.f32.mrf.mxu1  ;;  %v587_v43 = vpop.f32.mrf.mxu0 }
 0x1ee   : > { %v591_v12 = vadd.f32 %v581_v48, %v442_v47  ;;  %v446_v42 = vadd.f32 %v445_v60, %v335_v30 }
 0x1ef   : > { %v447_v1 = vpop.f32.mrf.mxu1  ;;  %v809_v4 = vpop.f32.mrf.mxu0 }
 0x1f0   : > { %v448_v15 = vadd.f32 %v447_v1, %v337_v31  ;;  %v592_v47 = vadd.f32 %v585_v0, %v446_v42 }
 0x1f1   : > { %v719_v58 = vpop.f32.mrf.mxu1  ;;  %v811_v57 = vpop.f32.mrf.mxu0 }
 0x1f2   : > { %v730_v8 = vadd.f32 %v719_v58, %v590_v10  ;;  %v593_v59 = vadd.f32 %v587_v43, %v448_v15 }
 0x1f3   : > { %v721_v39 = vpop.f32.mrf.mxu1 }
 0x1f4   : > { %v731_v13 = vadd.f32 %v721_v39, %v591_v12  ;;  %v820_v25 = vadd.f32 %v809_v4, %v730_v8 }
 0x1f5   : > { %v725_v27 = vpop.f32.mrf.mxu1 }
 0x1f6   : > { %v821_v23 = vadd.f32 %v811_v57, %v731_v13  ;;  %v732_v4 = vadd.f32 %v725_v27, %v592_v47 }
 0x1f7   : > { %v727_v22 = vpop.f32.mrf.mxu1  ;;  %v815_v44 = vpop.f32.mrf.mxu0 }
 0x1f8   : > { %v733_v57 = vadd.f32 %v727_v22, %v593_v59 }
 0x1f9   : > { %v817_v7 = vpop.f32.mrf.mxu0  ;;  %v953_v3 = vpop.f32.mrf.mxu1 }
 0x1fa   : > { %v964_v34 = vadd.f32 %v953_v3, %v820_v25  ;;  %v823_v30 = vadd.f32 %v817_v7, %v733_v57 }
 0x1fb   : > { %v955_v9 = vpop.f32.mrf.mxu1  ;;  %v1091_v6 = vpop.f32.mrf.mxu0 }
 0x1fc   : > { %v965_v28 = vadd.f32 %v955_v9, %v821_v23  ;;  %v1102_v37 = vadd.f32 %v1091_v6, %v964_v34 }
 0x1fd   : > { %v959_v11 = vpop.f32.mrf.mxu1  ;;  %v1093_v19 = vpop.f32.mrf.mxu0 }
 0x1fe   : > { %v1103_v54 = vadd.f32 %v1093_v19, %v965_v28 }
 0x1ff   : > { %v961_v21 = vpop.f32.mrf.mxu1  ;;  %v1097_v26 = vpop.f32.mrf.mxu0 }
 0x200   : > { %v967_v31 = vadd.f32 %v961_v21, %v823_v30  ;;  %v4935_v30 = vld [vmem:[#allocation3_spill] sm:$0xff] }
 0x201   : > { %v1208_v2 = vpop.f32.mrf.mxu1  ;;  %v1099_v40 = vpop.f32.mrf.mxu0 }
 0x202   : > { %v1219_v35 = vadd.f32 %v1208_v2, %v1102_v37  ;;  %v822_v2 = vadd.f32 %v815_v44, %v732_v4  ;;  %v1105_v22 = vadd.f32 %v1099_v40, %v967_v31  ;;  %v4933_v4 = vld [vmem:[#allocation14_spill] sm:$0xff]  ;;  %v4939_v31 = vld [vmem:[#allocation4_spill] sm:$0xff] }
 0x203   : > { %v1210_v53 = vpop.f32.mrf.mxu1 }
 0x204   : > { %v1220_v58 = vadd.f32 %v1210_v53, %v1103_v54  ;;  %v966_v59 = vadd.f32 %v959_v11, %v822_v2 }
 0x205   : > { %v1214_v53 = vpop.f32.mrf.mxu1 }
 0x206   : > { %v1104_v27 = vadd.f32 %v1097_v26, %v966_v59  ;;  %v4938_v59 = vld [vmem:[#allocation7_spill] sm:$0xff] }
 0x207   : > { %v1216_v1 = vpop.f32.mrf.mxu1 }
 0x208   : > { %v1221_v9 = vadd.f32 %v1214_v53, %v1104_v27  ;;  %v1222_v12 = vadd.f32 %v1216_v1, %v1105_v22  ;;  %v4937_v53 = vld [vmem:[#allocation5_spill] sm:$0xff]  ;;  %v4942_v1 = vld [vmem:[#allocation11_spill] sm:$0xff]  ;;  %v4943_v22 = vld [vmem:[#allocation8_spill] sm:$0xff] }
 0x20b   : > { %v1346_v48 = vpop.f32.mrf.mxu0 }
 0x20c   : > { %v4284_v39 = vadd.f32 %v1346_v48, %v1219_v35 }
 0x20d   : > { %v1348_v10 = vpop.f32.mrf.mxu0 }
 0x20e   : > { %v4286_v3 = vadd.f32 %v1348_v10, %v1220_v58  ;;  %1391 = vrot.lane.b32.xlu1 %v4284_v39, %s3781_s15  ;;  %v1372_v15 = vmul.f32 %v4284_v39, %v3984_v51  ;;  %v1602_v43 = vmul.f32 %v4284_v39, %v4014_v61  ;;  %v1724_v6 = vmul.f32 %v4284_v39, %v4031_v5 }
 0x20f   : > { %v1352_v60 = vpop.f32.mrf.mxu0  ;;  %v1941_v26 = vmul.f32 %v4284_v39, %v3960_v41  ;;  %v2063_v19 = vmul.f32 %v4284_v39, %v3978_v49  ;;  %v2301_v57 = vmul.f32 %v4284_v39, %v4933_v4 }
 0x210   : > { %1393 = vrot.lane.b32.xlu0 %v4286_v3, %s3781_s15  ;;  %v1373_v34 = vmul.f32 %v4286_v3, %v3900_v17  ;;  %v1603_v0 = vmul.f32 %v4286_v3, %v3917_v24  ;;  %v1725_v44 = vmul.f32 %v4286_v3, %v3937_v32  ;;  %v4309_v11 = vadd.f32 %v1352_v60, %v1221_v9  ;;  %v4940_v60 = vld [vmem:[#allocation10_spill] sm:$0xff]  ;;  %v4945_v9 = vld [vmem:[#allocation9_spill] sm:$0xff] }
 0x211   : > { %v1354_v7 = vpop.f32.mrf.mxu0  ;;  %v1942_v23 = vmul.f32 %v4286_v3, %v4044_v18  ;;  %v2064_v42 = vmul.f32 %v4286_v3, %v4082_v45  ;;  %v2302_v47 = vmul.f32 %v4286_v3, %v4106_v55 }
 0x212   : > { %1502 = vrot.lane.b32.xlu1 %v1373_v34, %s3780_s9  ;;  %v4311_v8 = vadd.f32 %v1354_v7, %v1222_v12  ;;  %v1375_v13 = vmul.f32 %v4309_v11, %v4019_v62  ;;  %v1727_v21 = vmul.f32 %v4309_v11, %v4040_v14  ;;  %v1944_v25 = vmul.f32 %v4309_v11, %v3952_v38  ;;  %v4934_v34 = vld [vmem:[#allocation12_spill] sm:$0xff]  ;;  %v4944_v7 = vld [vmem:[#allocation13_spill] sm:$0xff] }
 0x213   : > { %v2066_v28 = vmul.f32 %v4309_v11, %v3970_v46  ;;  %v1605_v40 = vmul.f32 %v4309_v11, %v3999_v56  ;;  %v2304_v2 = vmul.f32 %v4309_v11, %v4934_v34 }
 0x214   : > { %1500 = vrot.lane.b32.xlu0 %v1372_v15, %s3780_s9  ;;  %v1606_v37 = vmul.f32 %v4311_v8, %v3908_v20  ;;  %v1376_v54 = vmul.f32 %v4311_v8, %v3898_v16  ;;  %v1945_v35 = vmul.f32 %v4311_v8, %v4059_v33  ;;  %v1728_v48 = vmul.f32 %v4311_v8, %v3929_v29  ;;  %v4936_v15 = vld [vmem:[#allocation15_spill] sm:$0xff] }
 0x215   : > { %v2067_v58 = vmul.f32 %v4311_v8, %v4063_v36  ;;  %v2305_v10 = vmul.f32 %v4311_v8, %v4091_v50 }
 0x216   : > { %1620 = vrot.lane.b32.xlu1 %v1603_v0, %s3779_s7  ;;  %v4396_v0 = vpop.permute.xlu1 %1504 }
 0x218   : > { %1618 = vrot.lane.b32.xlu0 %v1602_v43, %s3779_s7  ;;  %v4941_v43 = vld [vmem:[#allocation6_spill] sm:$0xff] }
 0x21a   : > { %1742 = vrot.lane.b32.xlu1 %v1725_v44, %s3778_s6  ;;  %v1623_v27 = vpop.permute.xlu1 %1622  ;;  %v3732_v44 = vpop.permute.xlu0 %3731 }
 0x21c   : > { %1740 = vrot.lane.b32.xlu0 %v1724_v6, %s3778_s6 }
 0x21e   : > { %1399 = vrot.lane.b32.xlu1 %v4311_v8, %s3781_s15  ;;  %v4410_v12 = vpop.permute.xlu1 %1744  ;;  %v4412_v6 = vpop.permute.xlu0 %1498 }
 0x220   : > { %1956 = vrot.lane.b32.xlu0 %v1941_v26, %s3777_s5 }
 0x222   : > { %1506 = vrot.lane.b32.xlu1 %v1375_v13, %s3780_s9  ;;  %v4414_v26 = vpop.permute.xlu1 %1960  ;;  %v1617_v13 = vpop.permute.xlu0 %1616 }
 0x224   : > { %2078 = vrot.lane.b32.xlu0 %v2063_v19, %s3776_s27 }
 0x226   : > { %1746 = vrot.lane.b32.xlu1 %v1727_v21, %s3778_s6  ;;  %v4416_v19 = vpop.permute.xlu1 %2088  ;;  %v4418_v21 = vpop.permute.xlu0 %1738 }
 0x228   : > { %1397 = vrot.lane.b32.xlu0 %v4309_v11, %s3781_s15 }
 0x22a   : > { %1962 = vrot.lane.b32.xlu1 %v1944_v25, %s3777_s5  ;;  %v4420_v25 = vpop.permute.xlu1 %2082 }
 0x22c   : > { %1958 = vrot.lane.b32.xlu0 %v1942_v23, %s3777_s5  ;;  %v4422_v23 = vpop.permute.xlu0 %1966 }
 0x22e   : > { %2084 = vrot.lane.b32.xlu1 %v2066_v28, %s3776_s27 }
 0x230   : > { %2080 = vrot.lane.b32.xlu0 %v2064_v42, %s3776_s27 }
 0x232   : > { %1626 = vrot.lane.b32.xlu1 %v1606_v37, %s3779_s7 }
 0x234   : > { %1624 = vrot.lane.b32.xlu0 %v1605_v40, %s3779_s7 }
 0x236   : > { %2202 = vrot.lane.b32.xlu1 %v4311_v8, %s3782_s16 }
 0x238   : > { %1508 = vrot.lane.b32.xlu0 %v1376_v54, %s3780_s9 }
 0x23a   : > { %2200 = vrot.lane.b32.xlu1 %v4309_v11, %s3782_s16 }
 0x23c   : > { %3736 = vrot.lane.b32.xlu0 %v4932_v52, %s3782_s16 }
 0x23e   : > { %1964 = vrot.lane.b32.xlu1 %v1945_v35, %s3777_s5 }
 0x240   : > { %1748 = vrot.lane.b32.xlu0 %v1728_v48, %s3778_s6 }
 0x242   : > { %2194 = vrot.lane.b32.xlu1 %v4284_v39, %s3782_s16 }
 0x244   : > { %2196 = vrot.lane.b32.xlu0 %v4286_v3, %s3782_s16 }
 0x246   : > { %2318 = vrot.lane.b32.xlu1 %v2302_v47, %s3774_s18 }
 0x248   : > { %2086 = vrot.lane.b32.xlu0 %v2067_v58, %s3776_s27 }
 0x24a   : > { %2324 = vrot.lane.b32.xlu1 %v2305_v10, %s3774_s18 }
 0x24c   : > { %2326 = vrot.lane.b32.xlu0 %v4115_v63, %s3774_s18 }
 0x24e   : > { %2316 = vrot.lane.b32.xlu1 %v2301_v57, %s3774_s18 }
 0x250   : > { %2322 = vrot.lane.b32.xlu0 %v2304_v2, %s3774_s18 }
 0x252   : > { %2566 = vrot.lane.b32.xlu1 %v4935_v30, %s3780_s9 }
 0x254   : > { %2320 = vrot.lane.b32.xlu0 %v4936_v15, %s3774_s18 }
 0x256   : > { %2684 = vrot.lane.b32.xlu1 %v4937_v53, %s3779_s7  ;;  %v3733_v53 = vunpack.i.l.bf16 %v3732_v44 }
 0x258   : > { %3741 = vrot.lane.b32.xlu0 %v4932_v52, %s3781_s15 }
 0x25a   : > { %2806 = vrot.lane.b32.xlu1 %v4938_v59, %s3778_s6 }
 0x25c   : > { %2560 = vrot.lane.b32.xlu0 %v4939_v31, %s3780_s9 }
 0x25e   : > { %3022 = vrot.lane.b32.xlu1 %v4940_v60, %s3777_s5 }
 0x260   : > { %2678 = vrot.lane.b32.xlu0 %v4941_v43, %s3779_s7  ;;  %v3734_v43 = vunpack.i.h.bf16 %v3732_v44  ;;  %v3622_v44 = vld [vmem:[%s4898_s1 + $0xa8] sm:$0xff] }
 0x262   : > { %3150 = vrot.lane.b32.xlu1 %v4942_v1, %s3776_s27 }
 0x264   : > { %2800 = vrot.lane.b32.xlu0 %v4943_v22, %s3778_s6 }
 0x266   : > { %3144 = vrot.lane.b32.xlu1 %v4944_v7, %s3776_s27  ;;  %v3621_v7 = vld [vmem:[%s4898_s1 + $0xa0] sm:$0xff] }
 0x268   : > { %3028 = vrot.lane.b32.xlu0 %v4945_v9, %s3777_s5 }
 0x280   : > { %v1392_v28 = vpop.permute.xlu1 %1391 }
 0x281   : > { %v1401_v9 = vsel %vm248_vm2, %v3734_v43, %v1392_v28 }
 0x282   : > { %v1394_v42 = vpop.permute.xlu0 %1393 }
 0x283   : > { %v1402_v22 = vsel %vm248_vm2, %v1392_v28, %v1394_v42 }
 0x284   : > { %v1503_v37 = vpop.permute.xlu1 %1502 }
 0x286   : > { %v1501_v40 = vpop.permute.xlu0 %1500 }
 0x288   : > { %v1621_v54 = vpop.permute.xlu1 %1620 }
 0x28a   : > { %v1619_v35 = vpop.permute.xlu0 %1618 }
 0x28b   : > { %v1629_v43 = vsel %vm498_vm5, %v1619_v35, %v1621_v54  ;;  %v3619_v54 = vld [vmem:[%s4898_s1 + $0x90] sm:$0xff] }
 0x28c   : > { %v4424_v48 = vpop.permute.xlu1 %1742 }
 0x28e   : > { %v4426_v47 = vpop.permute.xlu0 %1740 }
 0x290   : > { %v1400_v58 = vpop.permute.xlu1 %1399 }
 0x292   : > { %v4428_v10 = vpop.permute.xlu0 %1956 }
 0x294   : > { %v1507_v57 = vpop.permute.xlu1 %1506 }
 0x296   : > { %v4430_v2 = vpop.permute.xlu0 %2078 }
 0x298   : > { %v4432_v30 = vpop.permute.xlu1 %1746 }
 0x29a   : > { %v1398_v59 = vpop.permute.xlu0 %1397 }
 0x29b   : > { %v1403_v31 = vsel %vm248_vm2, %v3733_v53, %v1398_v59  ;;  %v1404_v60 = vsel %vm248_vm2, %v1398_v59, %v1400_v58 }
 0x29c   : > { %1443 = vmatprep.subr.mxu1 %v1404_v60  ;;  %v4436_v1 = vpop.permute.xlu1 %1962 }
 0x29d   : > { %1444 = vmatpush1.msra.mxu1 %v1403_v31 }
 0x29e   : > { %v4443_v15 = vpop.permute.xlu0 %1958  ;;  %1445 = vmatprep.subr.mxu1 %v1402_v22  ;;  %v1628_v22 = vsel %vm498_vm5, %v1617_v13, %v1619_v35  ;;  %v1511_v13 = vsel %vm358_vm6, %v1501_v40, %v1503_v37  ;;  %v1510_v35 = vsel %vm358_vm6, %v4412_v6, %v1501_v40  ;;  %v1752_v40 = vsel %vm638_vm4, %v4410_v12, %v4432_v30 }
 0x29f   : > { %1446 = vmatpush1.msra.mxu1 %v1401_v9  ;;  %v3627_v9 = vld [vmem:[%s4898_s1 + $0xb0] sm:$0xff] }
 0x2a0   : > { %v4445_v53 = vpop.permute.xlu1 %2084  ;;  %3623 = vmatmul.mubr.msk.f32.vlgmr.msra.gmra.mxu1 %vm248_vm2, %v3621_v7 }
 0x2a1   : > { %1485 = vmatprep.mubr.f32.mxu1 %v4932_v52 }
 0x2a2   : > { %v4452_v42 = vpop.permute.xlu0 %2080 }
 0x2a4   : > { %v1627_v58 = vpop.permute.xlu1 %1626  ;;  %3624 = vmatmul.mubr.msk.f32.gmra.mxu1 %vm248_vm2, %v3622_v44 }
 0x2a5   : > { %1706 = vmatprep.mubr.f32.mxu1 %v4932_v52 }
 0x2a6   : > { %v1625_v28 = vpop.permute.xlu0 %1624 }
 0x2a7   : > { %v1630_v59 = vsel %vm498_vm5, %v1623_v27, %v1625_v28  ;;  %v1631_v31 = vsel %vm498_vm5, %v1625_v28, %v1627_v58  ;;  %v1512_v27 = vsel %vm358_vm6, %v4396_v0, %v1507_v57  ;;  %v1751_v28 = vsel %vm638_vm4, %v4426_v47, %v4424_v48  ;;  %v3636_v48 = vld [vmem:[%s4898_s1 + $0xd8] sm:$0xff] }
 0x2a8   : > { %1670 = vmatprep.subr.mxu1 %v1631_v31  ;;  %v4458_v60 = vpop.permute.xlu1 %2202  ;;  %v1750_v31 = vsel %vm638_vm4, %v4418_v21, %v4426_v47  ;;  %v3632_v47 = vld [vmem:[%s4898_s1 + $0xc8] sm:$0xff] }
 0x2a9   : > { %1671 = vmatpush1.msra.mxu1 %v1630_v59  ;;  %v3631_v59 = vld [vmem:[%s4898_s1 + $0xc0] sm:$0xff] }
 0x2aa   : > { %1672 = vmatprep.subr.mxu1 %v1629_v43  ;;  %v1509_v7 = vpop.permute.xlu0 %1508 }
 0x2ab   : > { %1673 = vmatpush1.msra.mxu1 %v1628_v22  ;;  %v1513_v44 = vsel %vm358_vm6, %v1507_v57, %v1509_v7  ;;  %v1968_v7 = vsel %vm602_vm3, %v4428_v10, %v4443_v15  ;;  %v3639_v10 = vld [vmem:[%s4898_s1 + $0xe0] sm:$0xff] }
 0x2ac   : > { %1882 = vmatprep.subr.mxu1 %v4311_v8  ;;  %v4469_v58 = vpop.permute.xlu1 %2200  ;;  %1552 = vmatprep.subr.mxu0 %v1513_v44  ;;  %v3628_v8 = vld [vmem:[%s4898_s1 + $0xb8] sm:$0xff] }
 0x2ad   : > { %1553 = vmatpush1.msra.mxu0 %v1512_v27  ;;  %3629 = vmatmul.mubr.msk.f32.vlgmr.msra.gmra.mxu1 %vm248_vm2, %v3627_v9 }
 0x2ae   : > { %1883 = vmatpush1.msra.mxu1 %v4309_v11  ;;  %1554 = vmatprep.subr.mxu0 %v1511_v13  ;;  %v4479_v0 = vpop.permute.xlu0 %3736  ;;  %v3620_v11 = vld [vmem:[%s4898_s1 + $0x98] sm:$0xff] }
 0x2af   : > { %1884 = vmatprep.subr.mxu1 %v4286_v3  ;;  %1555 = vmatpush1.msra.mxu0 %v1510_v35  ;;  %v3738_v43 = vunpack.i.l.bf16 %v4479_v0  ;;  %v2208_v35 = vsel %vm1127_vm7, %v4469_v58, %v4458_v60 }
 0x2b0   : > { %1885 = vmatpush1.msra.mxu1 %v4284_v39  ;;  %v1965_v37 = vpop.permute.xlu1 %1964  ;;  %3625 = vmatmul.mubr.msk.f32.vlgmr.msra.gmra.mxu0 %vm248_vm2, %v3619_v54  ;;  %v3635_v39 = vld [vmem:[%s4898_s1 + $0xd0] sm:$0xff]  ;;  %v3739_v54 = vunpack.i.h.bf16 %v4479_v0  ;;  %v3644_v0 = vld [vmem:[%s4898_s1 + $0xf8] sm:$0xff] }
 0x2b1   : > { %1594 = vmatprep.mubr.f32.mxu0 %v4932_v52  ;;  %1712 = vmatprep.mubr.f32.mxu1 %v4932_v52  ;;  %v1970_v22 = vsel %vm602_vm3, %v4436_v1, %v1965_v37  ;;  %v2209_v44 = vsel %vm1127_vm7, %v4458_v60, %v3738_v43 }
 0x2b2   : > { %v1749_v6 = vpop.permute.xlu0 %1748  ;;  %3630 = vmatmul.mubr.msk.f32.gmra.mxu1 %vm248_vm2, %v3628_v8 }
 0x2b3   : > { %v1753_v3 = vsel %vm638_vm4, %v4432_v30, %v1749_v6  ;;  %1918 = vmatprep.mubr.f32.mxu1 %v4932_v52  ;;  %v1971_v30 = vsel %vm602_vm3, %v1965_v37, %v4422_v23  ;;  %v1969_v23 = vsel %vm602_vm3, %v4443_v15, %v4414_v26  ;;  %v2091_v15 = vsel %vm462_vm1, %v4452_v42, %v4420_v25 }
 0x2b4   : > { %v2195_v57 = vpop.permute.xlu1 %2194  ;;  %3626 = vmatmul.mubr.msk.f32.gmra.mxu0 %vm248_vm2, %v3620_v11  ;;  %1792 = vmatprep.subr.mxu0 %v1753_v3  ;;  %v3647_v11 = vld [vmem:[%s4898_s1 + $0x100] sm:$0xff] }
 0x2b5   : > { %1793 = vmatpush1.msra.mxu0 %v1752_v40  ;;  %1828 = vmatprep.mubr.f32.mxu0 %v4932_v52 }
 0x2b6   : > { %1794 = vmatprep.subr.mxu0 %v1751_v28  ;;  %v2197_v12 = vpop.permute.xlu0 %2196  ;;  %3637 = vmatmul.mubr.msk.f32.vlgmr.msra.gmra.mxu1 %vm248_vm2, %v3635_v39  ;;  %v3651_v39 = vld [vmem:[%s4898_s1 + $0x110] sm:$0xff]  ;;  %v3652_v28 = vld [vmem:[%s4898_s1 + $0x118] sm:$0xff] }
 0x2b7   : > { %1795 = vmatpush1.msra.mxu0 %v1750_v31  ;;  %1924 = vmatprep.mubr.f32.mxu1 %v4932_v52  ;;  %v2206_v8 = vsel %vm1127_vm7, %v2195_v57, %v2197_v12  ;;  %v3648_v57 = vld [vmem:[%s4898_s1 + $0x108] sm:$0xff] }
 0x2b8   : > { %v2319_v21 = vpop.permute.xlu1 %2318  ;;  %3633 = vmatmul.mubr.msk.f32.vlgmr.msra.gmra.mxu0 %vm248_vm2, %v3631_v59  ;;  %2010 = vmatprep.subr.mxu0 %v1971_v30 }
 0x2b9   : > { %2011 = vmatpush1.msra.mxu0 %v1970_v22  ;;  %1834 = vmatprep.mubr.f32.mxu0 %v4932_v52 }
 0x2ba   : > { %2012 = vmatprep.subr.mxu0 %v1969_v23  ;;  %v2087_v1 = vpop.permute.xlu0 %2086  ;;  %3638 = vmatmul.mubr.msk.f32.gmra.mxu1 %vm248_vm2, %v3636_v48 }
 0x2bb   : > { %v2092_v9 = vsel %vm462_vm1, %v4445_v53, %v2087_v1  ;;  %2013 = vmatpush1.msra.mxu0 %v1968_v7  ;;  %v2093_v26 = vsel %vm462_vm1, %v2087_v1, %v4416_v19  ;;  %2168 = vmatprep.mubr.f32.mxu1 %v4932_v52  ;;  %v3643_v19 = vld [vmem:[%s4898_s1 + $0xf0] sm:$0xff]  ;;  %v2090_v53 = vsel %vm462_vm1, %v4430_v2, %v4452_v42  ;;  %v3640_v42 = vld [vmem:[%s4898_s1 + $0xe8] sm:$0xff] }
 0x2bc   : > { %3634 = vmatmul.mubr.msk.f32.gmra.mxu0 %vm248_vm2, %v3632_v47  ;;  %2132 = vmatprep.subr.mxu1 %v2093_v26  ;;  %v2325_v27 = vpop.permute.xlu1 %2324  ;;  %v2207_v2 = vsel %vm1127_vm7, %v2197_v12, %v3739_v54 }
 0x2bd   : > { %2248 = vmatprep.subr.mxu0 %v2209_v44  ;;  %2133 = vmatpush1.msra.mxu1 %v2092_v9 }
 0x2be   : > { %2134 = vmatprep.subr.mxu1 %v2091_v15  ;;  %v2327_v13 = vpop.permute.xlu0 %2326  ;;  %2046 = vmatprep.mubr.f32.mxu0 %v4932_v52 }
 0x2bf   : > { %2135 = vmatpush1.msra.mxu1 %v2090_v53  ;;  %v2331_v25 = vsel %vm210_vm0, %v2325_v27, %v2327_v13 }
 0x2c0   : > { %3641 = vmatmul.mubr.msk.f32.vlgmr.msra.gmra.mxu0 %vm248_vm2, %v3639_v10  ;;  %3645 = vmatmul.mubr.msk.f32.vlgmr.msra.gmra.mxu1 %vm248_vm2, %v3643_v19  ;;  %v2317_v37 = vpop.permute.xlu1 %2316 }
 0x2c1   : > { %2249 = vmatpush1.msra.mxu0 %v2208_v35  ;;  %2370 = vmatprep.subr.mxu1 %v2331_v25  ;;  %v2328_v40 = vsel %vm210_vm0, %v2317_v37, %v2319_v21 }
 0x2c2   : > { %2250 = vmatprep.subr.mxu0 %v2207_v2  ;;  %v2323_v60 = vpop.permute.xlu0 %2322  ;;  %2052 = vmatprep.mubr.f32.mxu0 %v4932_v52 }
 0x2c3   : > { %v2330_v58 = vsel %vm210_vm0, %v2323_v60, %v2325_v27  ;;  %2251 = vmatpush1.msra.mxu0 %v2206_v8  ;;  %2174 = vmatprep.mubr.f32.mxu1 %v4932_v52 }
 0x2c4   : > { %3642 = vmatmul.mubr.msk.f32.gmra.mxu0 %vm248_vm2, %v3640_v42  ;;  %3646 = vmatmul.mubr.msk.f32.gmra.mxu1 %vm248_vm2, %v3644_v0 }
 0x2c5   : > { %2371 = vmatpush1.msra.mxu1 %v2330_v58  ;;  %2284 = vmatprep.mubr.f32.mxu0 %v4932_v52 }
 0x2c6   : > { %v2321_v6 = vpop.permute.xlu0 %2320  ;;  %2406 = vmatprep.mubr.f32.mxu1 %v4932_v52 }
 0x2c7   : > { %v2329_v3 = vsel %vm210_vm0, %v2319_v21, %v2321_v6 }
 0x2c8   : > { %3649 = vmatmul.mubr.msk.f32.vlgmr.msra.gmra.mxu0 %vm248_vm2, %v3647_v11  ;;  %2372 = vmatprep.subr.mxu1 %v2329_v3 }
 0x2c9   : > { %2373 = vmatpush1.msra.mxu1 %v2328_v40  ;;  %2290 = vmatprep.mubr.f32.mxu0 %v4932_v52 }
 0x2ca   : > { %3653 = vmatmul.mubr.msk.f32.vlgmr.msra.gmra.mxu1 %vm248_vm2, %v3651_v39 }
 0x2cb   : > { %2412 = vmatprep.mubr.f32.mxu1 %v4932_v52 }
 0x2cc   : > { %3650 = vmatmul.mubr.msk.f32.gmra.mxu0 %vm248_vm2, %v3648_v57 }
 0x2cd   : > { %2541 = vmatprep.mubr.f32.mxu0 %v4932_v52 }
 0x2ce   : > { %3654 = vmatmul.mubr.msk.f32.gmra.mxu1 %vm248_vm2, %v3652_v28 }
 0x2cf   : > { %2650 = vmatprep.mubr.f32.mxu1 %v4932_v52 }
 0x360   : > { %v1481_v59 = vpop.f32.mrf.mxu1 }
 0x362   : > { %v1483_v31 = vpop.f32.mrf.mxu1 }
 0x364   : > { %v1487_v12 = vpop.f32.mrf.mxu1 }
 0x366   : > { %v1489_v30 = vpop.f32.mrf.mxu1 }
 0x36d   : > { %v1708_v48 = vpop.f32.mrf.mxu1 }
 0x36f   : > { %v1710_v43 = vpop.f32.mrf.mxu1 }
 0x370   : > { %v1590_v22 = vpop.f32.mrf.mxu0 }
 0x371   : > { %v1591_v26 = vadd.f32 %v1590_v22, %v1481_v59 }
 0x372   : > { %v1592_v21 = vpop.f32.mrf.mxu0  ;;  %v1714_v23 = vpop.f32.mrf.mxu1 }
 0x373   : > { %v1593_v10 = vadd.f32 %v1592_v21, %v1483_v31  ;;  %v1719_v27 = vadd.f32 %v1708_v48, %v1591_v26 }
 0x374   : > { %v1596_v47 = vpop.f32.mrf.mxu0  ;;  %v1716_v7 = vpop.f32.mrf.mxu1 }
 0x375   : > { %v1720_v25 = vadd.f32 %v1710_v43, %v1593_v10  ;;  %v1597_v40 = vadd.f32 %v1596_v47, %v1487_v12 }
 0x376   : > { %v1598_v1 = vpop.f32.mrf.mxu0  ;;  %v1920_v9 = vpop.f32.mrf.mxu1 }
 0x377   : > { %v1599_v57 = vadd.f32 %v1598_v1, %v1489_v30  ;;  %v1721_v43 = vadd.f32 %v1714_v23, %v1597_v40  ;;  %v3742_v40 = vpop.permute.xlu0 %3741 }
 0x378   : > { %v1830_v44 = vpop.f32.mrf.mxu0  ;;  %v1922_v15 = vpop.f32.mrf.mxu1 }
 0x379   : > { %v1841_v35 = vadd.f32 %v1830_v44, %v1719_v27  ;;  %v1722_v21 = vadd.f32 %v1716_v7, %v1599_v57 }
 0x37a   : > { %v1832_v19 = vpop.f32.mrf.mxu0  ;;  %v1926_v53 = vpop.f32.mrf.mxu1 }
 0x37b   : > { %v1842_v42 = vadd.f32 %v1832_v19, %v1720_v25  ;;  %v1931_v60 = vadd.f32 %v1920_v9, %v1841_v35 }
 0x37c   : > { %v1836_v13 = vpop.f32.mrf.mxu0  ;;  %v1928_v54 = vpop.f32.mrf.mxu1 }
 0x37d   : > { %v1932_v11 = vadd.f32 %v1922_v15, %v1842_v42  ;;  %v1843_v9 = vadd.f32 %v1836_v13, %v1721_v43 }
 0x37e   : > { %v1838_v2 = vpop.f32.mrf.mxu0 }
 0x37f   : > { %v1844_v27 = vadd.f32 %v1838_v2, %v1722_v21  ;;  %v1933_v12 = vadd.f32 %v1926_v53, %v1843_v9 }
 0x380   : > { %v2048_v0 = vpop.f32.mrf.mxu0  ;;  %v2170_v8 = vpop.f32.mrf.mxu1 }
 0x381   : > { %v2059_v6 = vadd.f32 %v2048_v0, %v1931_v60  ;;  %v1934_v30 = vadd.f32 %v1928_v54, %v1844_v27 }
 0x382   : > { %v2050_v58 = vpop.f32.mrf.mxu0  ;;  %v2172_v37 = vpop.f32.mrf.mxu1 }
 0x383   : > { %v2060_v28 = vadd.f32 %v2050_v58, %v1932_v11  ;;  %v2181_v31 = vadd.f32 %v2170_v8, %v2059_v6 }
 0x384   : > { %v2054_v3 = vpop.f32.mrf.mxu0  ;;  %v2176_v39 = vpop.f32.mrf.mxu1 }
 0x385   : > { %v2182_v26 = vadd.f32 %v2172_v37, %v2060_v28  ;;  %v2061_v7 = vadd.f32 %v2054_v3, %v1933_v12  ;;  %v4704_v28 = vpop.permute.xlu0 %2560 }
 0x386   : > { %v2056_v59 = vpop.f32.mrf.mxu0  ;;  %v2178_v48 = vpop.f32.mrf.mxu1 }
 0x387   : > { %v2062_v1 = vadd.f32 %v2056_v59, %v1934_v30  ;;  %v2183_v0 = vadd.f32 %v2176_v39, %v2061_v7  ;;  %v2567_v39 = vpop.permute.xlu1 %2566 }
 0x388   : > { %v2286_v22 = vpop.f32.mrf.mxu0 }
 0x389   : > { %v2297_v44 = vadd.f32 %v2286_v22, %v2181_v31  ;;  %v2184_v8 = vadd.f32 %v2178_v48, %v2062_v1 }
 0x38a   : > { %v2288_v10 = vpop.f32.mrf.mxu0  ;;  %v2408_v19 = vpop.f32.mrf.mxu1 }
 0x38b   : > { %v2298_v25 = vadd.f32 %v2288_v10, %v2182_v26  ;;  %v4600_v15 = vadd.f32 %v2408_v19, %v2297_v44 }
 0x38c   : > { %v2410_v35 = vpop.f32.mrf.mxu1  ;;  %v2292_v47 = vpop.f32.mrf.mxu0 }
 0x38d   : > { %v4602_v42 = vadd.f32 %v2410_v35, %v2298_v25  ;;  %2453 = vrot.lane.b32.xlu1 %v4600_v15, %s3781_s15  ;;  %v2434_v13 = vmul.f32 %v4600_v15, %v3984_v51  ;;  %v2299_v60 = vadd.f32 %v2292_v47, %v2183_v0 }
 0x38e   : > { %v2294_v54 = vpop.f32.mrf.mxu0  ;;  %v2414_v2 = vpop.f32.mrf.mxu1 }
 0x38f   : > { %2455 = vrot.lane.b32.xlu0 %v4602_v42, %s3781_s15  ;;  %v2435_v23 = vmul.f32 %v4602_v42, %v3900_v17  ;;  %v2665_v53 = vmul.f32 %v4602_v42, %v3917_v24  ;;  %v2664_v17 = vmul.f32 %v4600_v15, %v4014_v61  ;;  %v2300_v58 = vadd.f32 %v2294_v54, %v2184_v8 }
 0x390   : > { %v2787_v51 = vmul.f32 %v4602_v42, %v3937_v32  ;;  %v2416_v37 = vpop.f32.mrf.mxu1  ;;  %v2786_v24 = vmul.f32 %v4600_v15, %v4031_v5  ;;  %v4625_v11 = vadd.f32 %v2414_v2, %v2299_v60  ;;  %v3003_v61 = vmul.f32 %v4600_v15, %v3960_v41  ;;  %v3657_v2 = vld [vmem:[%s4898_s1 + $0x130] sm:$0xff]  ;;  %v3658_v60 = vld [vmem:[%s4898_s1 + $0x138] sm:$0xff] }
 0x391   : > { %2564 = vrot.lane.b32.xlu1 %v2435_v23, %s3780_s9  ;;  %v4627_v6 = vadd.f32 %v2416_v37, %v2300_v58  ;;  %v3125_v5 = vmul.f32 %v4600_v15, %v3978_v49  ;;  %v3743_v23 = vunpack.i.l.bf16 %v3742_v40 }
 0x392   : > { %v2437_v32 = vmul.f32 %v4625_v11, %v4019_v62  ;;  %v2789_v3 = vmul.f32 %v4625_v11, %v4040_v14  ;;  %v3006_v41 = vmul.f32 %v4625_v11, %v3952_v38  ;;  %v3004_v62 = vmul.f32 %v4602_v42, %v4044_v18 }
 0x393   : > { %2562 = vrot.lane.b32.xlu0 %v2434_v13, %s3780_s9  ;;  %v3128_v49 = vmul.f32 %v4625_v11, %v3970_v46  ;;  %v3126_v14 = vmul.f32 %v4602_v42, %v4082_v45  ;;  %v2668_v38 = vmul.f32 %v4627_v6, %v3908_v20  ;;  %v2667_v18 = vmul.f32 %v4625_v11, %v3999_v56 }
 0x394   : > { %v2438_v46 = vmul.f32 %v4627_v6, %v3898_v16  ;;  %v3007_v20 = vmul.f32 %v4627_v6, %v4059_v33  ;;  %v2790_v56 = vmul.f32 %v4627_v6, %v3929_v29  ;;  %v3364_v16 = vmul.f32 %v4602_v42, %v4106_v55 }
 0x395   : > { %2682 = vrot.lane.b32.xlu1 %v2665_v53, %s3779_s7  ;;  %v3129_v33 = vmul.f32 %v4627_v6, %v4063_v36  ;;  %v3367_v29 = vmul.f32 %v4627_v6, %v4091_v50  ;;  %v3363_v45 = vmul.f32 %v4600_v15, %v4933_v4  ;;  %v3366_v55 = vmul.f32 %v4625_v11, %v4934_v34  ;;  %v4946_v36 = vld [vmem:[#allocation15_spill] sm:$0xff]  ;;  %v2685_v50 = vpop.permute.xlu1 %2684  ;;  %v2679_v4 = vpop.permute.xlu0 %2678 }
 0x396   : > { %v3744_v13 = vunpack.i.h.bf16 %v3742_v40 }
 0x397   : > { %2680 = vrot.lane.b32.xlu0 %v2664_v17, %s3779_s7 }
 0x399   : > { %2804 = vrot.lane.b32.xlu1 %v2787_v51, %s3778_s6  ;;  %v4702_v57 = vpop.permute.xlu1 %2806  ;;  %v4710_v31 = vpop.permute.xlu0 %2800 }
 0x39b   : > { %2802 = vrot.lane.b32.xlu0 %v2786_v24, %s3778_s6 }
 0x39d   : > { %2461 = vrot.lane.b32.xlu1 %v4627_v6, %s3781_s15  ;;  %v4714_v48 = vpop.permute.xlu0 %3028 }
 0x39f   : > { %3018 = vrot.lane.b32.xlu0 %v3003_v61, %s3777_s5 }
 0x3a1   : > { %2568 = vrot.lane.b32.xlu1 %v2437_v32, %s3780_s9 }
 0x3a3   : > { %3140 = vrot.lane.b32.xlu0 %v3125_v5, %s3776_s27 }
 0x3a5   : > { %2808 = vrot.lane.b32.xlu1 %v2789_v3, %s3778_s6 }
 0x3a7   : > { %2459 = vrot.lane.b32.xlu0 %v4625_v11, %s3781_s15 }
 0x3a9   : > { %3024 = vrot.lane.b32.xlu1 %v3006_v41, %s3777_s5 }
 0x3ab   : > { %3020 = vrot.lane.b32.xlu0 %v3004_v62, %s3777_s5  ;;  %v3663_v62 = vld [vmem:[%s4898_s1 + $0x140] sm:$0xff] }
 0x3ad   : > { %3146 = vrot.lane.b32.xlu1 %v3128_v49, %s3776_s27 }
 0x3af   : > { %3142 = vrot.lane.b32.xlu0 %v3126_v14, %s3776_s27 }
 0x3b1   : > { %2688 = vrot.lane.b32.xlu1 %v2668_v38, %s3779_s7 }
 0x3b3   : > { %2686 = vrot.lane.b32.xlu0 %v2667_v18, %s3779_s7 }
 0x3b5   : > { %3264 = vrot.lane.b32.xlu1 %v4627_v6, %s3782_s16 }
 0x3b7   : > { %2570 = vrot.lane.b32.xlu0 %v2438_v46, %s3780_s9  ;;  %v3655_v46 = vld [vmem:[%s4898_s1 + $0x120] sm:$0xff] }
 0x3b9   : > { %3262 = vrot.lane.b32.xlu1 %v4625_v11, %s3782_s16 }
 0x3bb   : > { %3746 = vrot.lane.b32.xlu0 %v4932_v52, %s3782_s16 }
 0x3bd   : > { %3026 = vrot.lane.b32.xlu1 %v3007_v20, %s3777_s5 }
 0x3bf   : > { %2810 = vrot.lane.b32.xlu0 %v2790_v56, %s3778_s6 }
 0x3c1   : > { %3256 = vrot.lane.b32.xlu1 %v4600_v15, %s3782_s16 }
 0x3c3   : > { %3258 = vrot.lane.b32.xlu0 %v4602_v42, %s3782_s16 }
 0x3c5   : > { %3380 = vrot.lane.b32.xlu1 %v3364_v16, %s3774_s18 }
 0x3c7   : > { %3148 = vrot.lane.b32.xlu0 %v3129_v33, %s3776_s27 }
 0x3c9   : > { %3386 = vrot.lane.b32.xlu1 %v3367_v29, %s3774_s18 }
 0x3cb   : > { %3388 = vrot.lane.b32.xlu0 %v4115_v63, %s3774_s18  ;;  %v4706_v63 = vpop.permute.xlu1 %3022 }
 0x3cd   : > { %3378 = vrot.lane.b32.xlu1 %v3363_v45, %s3774_s18 }
 0x3cf   : > { %3384 = vrot.lane.b32.xlu0 %v3366_v55, %s3774_s18  ;;  %v4708_v59 = vpop.permute.xlu1 %3150 }
 0x3d3   : > { %3382 = vrot.lane.b32.xlu0 %v4946_v36, %s3774_s18  ;;  %v4712_v34 = vpop.permute.xlu1 %3144  ;;  %v3667_v36 = vld [vmem:[%s4898_s1 + $0x150] sm:$0xff] }
 0x3ff   : > { %v2454_v22 = vpop.permute.xlu1 %2453 }
 0x400   : > { %v2463_v0 = vsel %vm248_vm2, %v3744_v13, %v2454_v22 }
 0x401   : > { %v2456_v43 = vpop.permute.xlu0 %2455 }
 0x402   : > { %v2464_v54 = vsel %vm248_vm2, %v2454_v22, %v2456_v43  ;;  %v3668_v22 = vld [vmem:[%s4898_s1 + $0x158] sm:$0xff] }
 0x403   : > { %v2565_v21 = vpop.permute.xlu1 %2564 }
 0x405   : > { %v2563_v26 = vpop.permute.xlu0 %2562 }
 0x406   : > { %v2573_v18 = vsel %vm358_vm6, %v2563_v26, %v2565_v21  ;;  %v2572_v20 = vsel %vm358_vm6, %v4704_v28, %v2563_v26 }
 0x407   : > { %v2683_v44 = vpop.permute.xlu1 %2682 }
 0x409   : > { %v2681_v10 = vpop.permute.xlu0 %2680 }
 0x40a   : > { %v2691_v5 = vsel %vm498_vm5, %v2681_v10, %v2683_v44  ;;  %v2690_v3 = vsel %vm498_vm5, %v2679_v4, %v2681_v10 }
 0x40b   : > { %v4716_v19 = vpop.permute.xlu1 %2804 }
 0x40d   : > { %v4718_v9 = vpop.permute.xlu0 %2802 }
 0x40e   : > { %v2813_v55 = vsel %vm638_vm4, %v4718_v9, %v4716_v19  ;;  %v3675_v19 = vld [vmem:[%s4898_s1 + $0x170] sm:$0xff] }
 0x40f   : > { %v2462_v27 = vpop.permute.xlu1 %2461 }
 0x411   : > { %v4720_v25 = vpop.permute.xlu0 %3018 }
 0x413   : > { %v2569_v35 = vpop.permute.xlu1 %2568 }
 0x414   : > { %v2574_v14 = vsel %vm358_vm6, %v2567_v39, %v2569_v35  ;;  %v2812_v39 = vsel %vm638_vm4, %v4710_v31, %v4718_v9 }
 0x415   : > { %v4722_v12 = vpop.permute.xlu0 %3140 }
 0x417   : > { %v4724_v30 = vpop.permute.xlu1 %2808 }
 0x418   : > { %v2814_v29 = vsel %vm638_vm4, %v4702_v57, %v4724_v30  ;;  %v3672_v57 = vld [vmem:[%s4898_s1 + $0x168] sm:$0xff] }
 0x419   : > { %v2460_v47 = vpop.permute.xlu0 %2459 }
 0x41a   : > { %v2465_v7 = vsel %vm248_vm2, %v3743_v23, %v2460_v47  ;;  %v2466_v1 = vsel %vm248_vm2, %v2460_v47, %v2462_v27  ;;  %v3676_v23 = vld [vmem:[%s4898_s1 + $0x178] sm:$0xff] }
 0x41b   : > { %2505 = vmatprep.subr.mxu0 %v2466_v1  ;;  %v4728_v53 = vpop.permute.xlu1 %3024  ;;  %v3680_v1 = vld [vmem:[%s4898_s1 + $0x188] sm:$0xff] }
 0x41c   : > { %2506 = vmatpush1.msra.mxu0 %v2465_v7 }
 0x41d   : > { %v4735_v8 = vpop.permute.xlu0 %3020  ;;  %2507 = vmatprep.subr.mxu0 %v2464_v54  ;;  %v3683_v54 = vld [vmem:[%s4898_s1 + $0x190] sm:$0xff] }
 0x41e   : > { %2508 = vmatpush1.msra.mxu0 %v2463_v0  ;;  %v3030_v43 = vsel %vm602_vm3, %v4720_v25, %v4735_v8  ;;  %v3679_v25 = vld [vmem:[%s4898_s1 + $0x180] sm:$0xff] }
 0x41f   : > { %v4737_v17 = vpop.permute.xlu1 %3146  ;;  %3659 = vmatmul.mubr.msk.f32.vlgmr.msra.gmra.mxu0 %vm248_vm2, %v3657_v2 }
 0x420   : > { %2547 = vmatprep.mubr.f32.mxu0 %v4932_v52 }
 0x421   : > { %v4744_v58 = vpop.permute.xlu0 %3142 }
 0x422   : > { %v3153_v10 = vsel %vm462_vm1, %v4744_v58, %v4712_v34 }
 0x423   : > { %v2689_v51 = vpop.permute.xlu1 %2688  ;;  %3660 = vmatmul.mubr.msk.f32.gmra.mxu0 %vm248_vm2, %v3658_v60  ;;  %v3684_v60 = vld [vmem:[%s4898_s1 + $0x198] sm:$0xff] }
 0x424   : > { %2768 = vmatprep.mubr.f32.mxu0 %v4932_v52 }
 0x425   : > { %v2687_v37 = vpop.permute.xlu0 %2686 }
 0x426   : > { %v2692_v24 = vsel %vm498_vm5, %v2685_v50, %v2687_v37  ;;  %v2693_v61 = vsel %vm498_vm5, %v2687_v37, %v2689_v51 }
 0x427   : > { %2732 = vmatprep.subr.mxu0 %v2693_v61  ;;  %v4750_v32 = vpop.permute.xlu1 %3264 }
 0x428   : > { %2733 = vmatpush1.msra.mxu0 %v2692_v24 }
 0x429   : > { %2734 = vmatprep.subr.mxu0 %v2691_v5  ;;  %v2571_v41 = vpop.permute.xlu0 %2570 }
 0x42a   : > { %2735 = vmatpush1.msra.mxu0 %v2690_v3  ;;  %v2575_v49 = vsel %vm358_vm6, %v2569_v35, %v2571_v41 }
 0x42b   : > { %2944 = vmatprep.subr.mxu0 %v4627_v6  ;;  %v4760_v38 = vpop.permute.xlu1 %3262  ;;  %2614 = vmatprep.subr.mxu1 %v2575_v49  ;;  %v3664_v6 = vld [vmem:[%s4898_s1 + $0x148] sm:$0xff] }
 0x42c   : > { %2615 = vmatpush1.msra.mxu1 %v2574_v14  ;;  %3665 = vmatmul.mubr.msk.f32.vlgmr.msra.gmra.mxu0 %vm248_vm2, %v3663_v62 }
 0x42d   : > { %2945 = vmatpush1.msra.mxu0 %v4625_v11  ;;  %2616 = vmatprep.subr.mxu1 %v2573_v18  ;;  %v4770_v56 = vpop.permute.xlu0 %3746  ;;  %v3656_v11 = vld [vmem:[%s4898_s1 + $0x128] sm:$0xff] }
 0x42e   : > { %2946 = vmatprep.subr.mxu0 %v4602_v42  ;;  %2617 = vmatpush1.msra.mxu1 %v2572_v20  ;;  %v3748_v28 = vunpack.i.l.bf16 %v4770_v56  ;;  %v3749_v35 = vunpack.i.h.bf16 %v4770_v56 }
 0x42f   : > { %2947 = vmatpush1.msra.mxu0 %v4600_v15  ;;  %v3027_v16 = vpop.permute.xlu1 %3026  ;;  %3661 = vmatmul.mubr.msk.f32.vlgmr.msra.gmra.mxu1 %vm248_vm2, %v3655_v46  ;;  %v3671_v15 = vld [vmem:[%s4898_s1 + $0x160] sm:$0xff] }
 0x430   : > { %2656 = vmatprep.mubr.f32.mxu1 %v4932_v52  ;;  %2774 = vmatprep.mubr.f32.mxu0 %v4932_v52  ;;  %v3033_v40 = vsel %vm602_vm3, %v3027_v16, %v4714_v48  ;;  %v3032_v4 = vsel %vm602_vm3, %v4728_v53, %v3027_v16  ;;  %v3031_v48 = vsel %vm602_vm3, %v4735_v8, %v4706_v63  ;;  %v3687_v8 = vld [vmem:[%s4898_s1 + $0x1a0] sm:$0xff] }
 0x431   : > { %v2811_v33 = vpop.permute.xlu0 %2810  ;;  %3666 = vmatmul.mubr.msk.f32.gmra.mxu0 %vm248_vm2, %v3664_v6  ;;  %v3271_v44 = vsel %vm1127_vm7, %v4750_v32, %v3748_v28 }
 0x432   : > { %v2815_v42 = vsel %vm638_vm4, %v4724_v30, %v2811_v33  ;;  %2980 = vmatprep.mubr.f32.mxu0 %v4932_v52  ;;  %v3270_v30 = vsel %vm1127_vm7, %v4760_v38, %v4750_v32 }
 0x433   : > { %v3257_v45 = vpop.permute.xlu1 %3256  ;;  %3662 = vmatmul.mubr.msk.f32.gmra.mxu1 %vm248_vm2, %v3656_v11  ;;  %2854 = vmatprep.subr.mxu1 %v2815_v42 }
 0x434   : > { %2855 = vmatpush1.msra.mxu1 %v2814_v29  ;;  %2890 = vmatprep.mubr.f32.mxu1 %v4932_v52 }
 0x435   : > { %2856 = vmatprep.subr.mxu1 %v2813_v55  ;;  %v3259_v50 = vpop.permute.xlu0 %3258  ;;  %3673 = vmatmul.mubr.msk.f32.vlgmr.msra.gmra.mxu0 %vm248_vm2, %v3671_v15 }
 0x436   : > { %2857 = vmatpush1.msra.mxu1 %v2812_v39  ;;  %2986 = vmatprep.mubr.f32.mxu0 %v4932_v52  ;;  %v3268_v47 = vsel %vm1127_vm7, %v3257_v45, %v3259_v50 }
 0x437   : > { %v3381_v31 = vpop.permute.xlu1 %3380  ;;  %3669 = vmatmul.mubr.msk.f32.vlgmr.msra.gmra.mxu1 %vm248_vm2, %v3667_v36  ;;  %3072 = vmatprep.subr.mxu1 %v3033_v40 }
 0x438   : > { %3073 = vmatpush1.msra.mxu1 %v3032_v4  ;;  %2896 = vmatprep.mubr.f32.mxu1 %v4932_v52 }
 0x439   : > { %3074 = vmatprep.subr.mxu1 %v3031_v48  ;;  %v3149_v21 = vpop.permute.xlu0 %3148  ;;  %3674 = vmatmul.mubr.msk.f32.gmra.mxu0 %vm248_vm2, %v3672_v57 }
 0x43a   : > { %v3154_v26 = vsel %vm462_vm1, %v4737_v17, %v3149_v21  ;;  %3075 = vmatpush1.msra.mxu1 %v3030_v43  ;;  %v3155_v63 = vsel %vm462_vm1, %v3149_v21, %v4708_v59  ;;  %3230 = vmatprep.mubr.f32.mxu0 %v4932_v52  ;;  %v3152_v59 = vsel %vm462_vm1, %v4722_v12, %v4744_v58  ;;  %v3688_v58 = vld [vmem:[%s4898_s1 + $0x1a8] sm:$0xff] }
 0x43b   : > { %3670 = vmatmul.mubr.msk.f32.gmra.mxu1 %vm248_vm2, %v3668_v22  ;;  %3194 = vmatprep.subr.mxu0 %v3155_v63  ;;  %v3387_v9 = vpop.permute.xlu1 %3386  ;;  %v3269_v12 = vsel %vm1127_vm7, %v3259_v50, %v3749_v35 }
 0x43c   : > { %3310 = vmatprep.subr.mxu1 %v3271_v44  ;;  %3195 = vmatpush1.msra.mxu0 %v3154_v26 }
 0x43d   : > { %3196 = vmatprep.subr.mxu0 %v3153_v10  ;;  %v3389_v27 = vpop.permute.xlu0 %3388  ;;  %3108 = vmatprep.mubr.f32.mxu1 %v4932_v52 }
 0x43e   : > { %3197 = vmatpush1.msra.mxu0 %v3152_v59  ;;  %v3393_v34 = vsel %vm210_vm0, %v3387_v9, %v3389_v27 }
 0x43f   : > { %3677 = vmatmul.mubr.msk.f32.vlgmr.msra.gmra.mxu1 %vm248_vm2, %v3675_v19  ;;  %3432 = vmatprep.subr.mxu0 %v3393_v34  ;;  %v3379_v53 = vpop.permute.xlu1 %3378 }
 0x440   : > { %3311 = vmatpush1.msra.mxu1 %v3270_v30  ;;  %3681 = vmatmul.mubr.msk.f32.vlgmr.msra.gmra.mxu0 %vm248_vm2, %v3679_v25  ;;  %v3390_v17 = vsel %vm210_vm0, %v3379_v53, %v3381_v31 }
 0x441   : > { %3312 = vmatprep.subr.mxu1 %v3269_v12  ;;  %v3385_v7 = vpop.permute.xlu0 %3384  ;;  %3114 = vmatprep.mubr.f32.mxu1 %v4932_v52 }
 0x442   : > { %v3392_v13 = vsel %vm210_vm0, %v3385_v7, %v3387_v9  ;;  %3313 = vmatpush1.msra.mxu1 %v3268_v47  ;;  %3236 = vmatprep.mubr.f32.mxu0 %v4932_v52 }
 0x443   : > { %3678 = vmatmul.mubr.msk.f32.gmra.mxu1 %vm248_vm2, %v3676_v23  ;;  %3433 = vmatpush1.msra.mxu0 %v3392_v13 }
 0x444   : > { %3682 = vmatmul.mubr.msk.f32.gmra.mxu0 %vm248_vm2, %v3680_v1  ;;  %3346 = vmatprep.mubr.f32.mxu1 %v4932_v52 }
 0x445   : > { %v3383_v2 = vpop.permute.xlu0 %3382  ;;  %3468 = vmatprep.mubr.f32.mxu0 %v4932_v52 }
 0x446   : > { %v3391_v0 = vsel %vm210_vm0, %v3381_v31, %v3383_v2 }
 0x447   : > { %3685 = vmatmul.mubr.msk.f32.vlgmr.msra.gmra.mxu1 %vm248_vm2, %v3683_v54  ;;  %3434 = vmatprep.subr.mxu0 %v3391_v0 }
 0x448   : > { %3435 = vmatpush1.msra.mxu0 %v3390_v17  ;;  %3352 = vmatprep.mubr.f32.mxu1 %v4932_v52 }
 0x449   : > { %3689 = vmatmul.mubr.msk.f32.vlgmr.msra.gmra.mxu0 %vm248_vm2, %v3687_v8 }
 0x44a   : > { %3474 = vmatprep.mubr.f32.mxu0 %v4932_v52 }
 0x44b   : > { %3686 = vmatmul.mubr.msk.f32.gmra.mxu1 %vm248_vm2, %v3684_v60 }
 0x44d   : > { %3690 = vmatmul.mubr.msk.f32.gmra.mxu0 %vm248_vm2, %v3688_v58 }
 0x4df   : > { %v2543_v51 = vpop.f32.mrf.mxu0 }
 0x4e1   : > { %v2545_v37 = vpop.f32.mrf.mxu0 }
 0x4e3   : > { %v2549_v24 = vpop.f32.mrf.mxu0 }
 0x4e5   : > { %v2551_v61 = vpop.f32.mrf.mxu0 }
 0x4ec   : > { %v2770_v32 = vpop.f32.mrf.mxu0 }
 0x4ee   : > { %v2772_v5 = vpop.f32.mrf.mxu0 }
 0x4ef   : > { %v2652_v3 = vpop.f32.mrf.mxu1 }
 0x4f0   : > { %v2653_v18 = vadd.f32 %v2652_v3, %v2543_v51 }
 0x4f1   : > { %v2654_v41 = vpop.f32.mrf.mxu1  ;;  %v2776_v62 = vpop.f32.mrf.mxu0 }
 0x4f2   : > { %v2655_v56 = vadd.f32 %v2654_v41, %v2545_v37  ;;  %v2781_v11 = vadd.f32 %v2770_v32, %v2653_v18 }
 0x4f3   : > { %v2658_v49 = vpop.f32.mrf.mxu1  ;;  %v2778_v14 = vpop.f32.mrf.mxu0 }
 0x4f4   : > { %v2659_v33 = vadd.f32 %v2658_v49, %v2549_v24  ;;  %v2782_v15 = vadd.f32 %v2772_v5, %v2655_v56 }
 0x4f5   : > { %v2660_v52 = vpop.f32.mrf.mxu1  ;;  %v2982_v38 = vpop.f32.mrf.mxu0 }
 0x4f6   : > { %v2661_v29 = vadd.f32 %v2660_v52, %v2551_v61  ;;  %v2783_v39 = vadd.f32 %v2776_v62, %v2659_v33 }
 0x4f7   : > { %v2892_v46 = vpop.f32.mrf.mxu1  ;;  %v2984_v20 = vpop.f32.mrf.mxu0 }
 0x4f8   : > { %v2903_v45 = vadd.f32 %v2892_v46, %v2781_v11  ;;  %v2784_v57 = vadd.f32 %v2778_v14, %v2661_v29 }
 0x4f9   : > { %v2894_v6 = vpop.f32.mrf.mxu1  ;;  %v2988_v16 = vpop.f32.mrf.mxu0 }
 0x4fa   : > { %v2904_v50 = vadd.f32 %v2894_v6, %v2782_v15  ;;  %v2993_v28 = vadd.f32 %v2982_v38, %v2903_v45 }
 0x4fb   : > { %v2898_v42 = vpop.f32.mrf.mxu1  ;;  %v2990_v55 = vpop.f32.mrf.mxu0 }
 0x4fc   : > { %v2905_v4 = vadd.f32 %v2898_v42, %v2783_v39  ;;  %v2994_v22 = vadd.f32 %v2984_v20, %v2904_v50 }
 0x4fd   : > { %v2900_v36 = vpop.f32.mrf.mxu1 }
 0x4fe   : > { %v2906_v43 = vadd.f32 %v2900_v36, %v2784_v57  ;;  %v2995_v44 = vadd.f32 %v2988_v16, %v2905_v4 }
 0x4ff   : > { %v3110_v40 = vpop.f32.mrf.mxu1 }
 0x500   : > { %v3232_v31 = vpop.f32.mrf.mxu0  ;;  %v3121_v21 = vadd.f32 %v3110_v40, %v2993_v28  ;;  %v2996_v9 = vadd.f32 %v2990_v55, %v2906_v43 }
 0x501   : > { %v3112_v48 = vpop.f32.mrf.mxu1 }
 0x502   : > { %v3234_v26 = vpop.f32.mrf.mxu0  ;;  %v3122_v10 = vadd.f32 %v3112_v48, %v2994_v22  ;;  %v3243_v27 = vadd.f32 %v3232_v31, %v3121_v21 }
 0x503   : > { %v3116_v63 = vpop.f32.mrf.mxu1 }
 0x504   : > { %v3238_v19 = vpop.f32.mrf.mxu0  ;;  %v3123_v25 = vadd.f32 %v3116_v63, %v2995_v44  ;;  %v3244_v30 = vadd.f32 %v3234_v26, %v3122_v10 }
 0x505   : > { %v3118_v59 = vpop.f32.mrf.mxu1 }
 0x506   : > { %v3240_v35 = vpop.f32.mrf.mxu0  ;;  %v3124_v12 = vadd.f32 %v3118_v59, %v2996_v9  ;;  %v3245_v1 = vadd.f32 %v3238_v19, %v3123_v25 }
 0x507   : > { %v3348_v34 = vpop.f32.mrf.mxu1 }
 0x508   : > { %v3359_v23 = vadd.f32 %v3348_v34, %v3243_v27  ;;  %v3246_v0 = vadd.f32 %v3240_v35, %v3124_v12 }
 0x509   : > { %v3350_v47 = vpop.f32.mrf.mxu1  ;;  %v3470_v7 = vpop.f32.mrf.mxu0 }
 0x50a   : > { %v3360_v13 = vadd.f32 %v3350_v47, %v3244_v30  ;;  %v3481_v53 = vadd.f32 %v3470_v7, %v3359_v23 }
 0x50b   : > { %v3354_v54 = vpop.f32.mrf.mxu1  ;;  %v3472_v2 = vpop.f32.mrf.mxu0 }
 0x50c   : > { %v3691_v8 = vmul.f32 -1.442695, %v3481_v53  ;;  %v3361_v17 = vadd.f32 %v3354_v54, %v3245_v1  ;;  %v3482_v60 = vadd.f32 %v3472_v2, %v3360_v13 }
 0x50d   : > { %v3356_v58 = vpop.f32.mrf.mxu1  ;;  %v3476_v51 = vpop.f32.mrf.mxu0 }
 0x50e   : > { %3750 = vpow2.f32 %v3691_v8  ;;  %v3692_v37 = vmul.f32 -1.442695, %v3482_v60  ;;  %v3362_v24 = vadd.f32 %v3356_v58, %v3246_v0  ;;  %v3483_v61 = vadd.f32 %v3476_v51, %v3361_v17 }
 0x50f   : > { %v3478_v32 = vpop.f32.mrf.mxu0 }
 0x510   : > { %3752 = vpow2.f32 %v3692_v37  ;;  %v3693_v5 = vmul.f32 -1.442695, %v3483_v61  ;;  %v3484_v3 = vadd.f32 %v3478_v32, %v3362_v24 }
 0x512   : > { %3754 = vpow2.f32 %v3693_v5  ;;  %v3694_v41 = vmul.f32 -1.442695, %v3484_v3 }
 0x514   : > { %3756 = vpow2.f32 %v3694_v41 }
 0x51b   : > { %v3751_v62 = vpop.eup %3750 }
 0x51c   : > { %v3497_v49 = vadd.f32 1.0, %v3751_v62 }
 0x51d   : > { %v3753_v14 = vpop.eup %3752 }
 0x51e   : > { %3758 = vrcp.f32 %v3497_v49  ;;  %v3498_v52 = vadd.f32 1.0, %v3753_v14 }
 0x51f   : > { %v3755_v38 = vpop.eup %3754 }
 0x520   : > { %3760 = vrcp.f32 %v3498_v52  ;;  %v3499_v18 = vadd.f32 1.0, %v3755_v38 }
 0x521   : > { %v3757_v46 = vpop.eup %3756 }
 0x522   : > { %3762 = vrcp.f32 %v3499_v18  ;;  %v3500_v20 = vadd.f32 1.0, %v3757_v46 }
 0x524   : > { %3764 = vrcp.f32 %v3500_v20 }
 0x52b   : > { %v3759_v56 = vpop.eup %3758 }
 0x52c   : > { %v3509_v6 = vmul.f32 %v3759_v56, %v3481_v53 }
 0x52d   : > { %v3761_v16 = vpop.eup %3760 }
 0x52e   : > { %3513 = vst [vmem:[%s170_s11] sm:$0xff] %v3509_v6  ;;  %v3510_v11 = vmul.f32 %v3761_v16, %v3482_v60 }
 0x52f   : > { %v3763_v33 = vpop.eup %3762 }
 0x530   : > { %3514 = vst [vmem:[%s170_s11 + $0x8] sm:$0xff] %v3510_v11  ;;  %v3511_v42 = vmul.f32 %v3763_v33, %v3483_v61 }
 0x531   : > { %v3765_v15 = vpop.eup %3764 }
 0x532   : > { %3515 = vst [vmem:[%s170_s11 + $0x10] sm:$0xff] %v3511_v42  ;;  %v3512_v29 = vmul.f32 %v3765_v15, %v3484_v3 }
 0x534   : > { %3516 = vst [vmem:[%s170_s11 + $0x18] sm:$0xff] %v3512_v29 }
 0x535 PF: > { %s13_s12 = sadd.s32 1, %s3772_s12  }
 0x536   : > { %p10_p4 = scmp.ge.s32.totalorder %s13_s12, 4  }
 0x538   :  { %12 = sbr.rel (!%p10_p4) target bundleno = 1 (0x1), region = 89 }

</bundles_post_ra>
